<compile_context>
chip_gen: v5e
topology: v5e:2x2
jax: 0.10.0
libtpu: 0.0.40
codegen_flags: <defaults>
</compile_context>

<pallas_src>
import jax
import jax.numpy as jnp
from jax import lax
from jax.experimental import pallas as pl
from jax.experimental.pallas import tpu as pltpu

EPS = 1e-5                      # nn.BatchNorm2d default
LANES = 128                     # channel dim padded to a multiple of the TPU lane width
VMEM_LIMIT = 32 * 1024 * 1024   # explicit scoped-VMEM budget (fits all of v5e/v6e/v7x)


def _conv_stats_kernel(xp_ref, w_ref, conv_ref, stats_ref):
    """Pass 1: 3x3 conv on one padded NHWC image + per-image BN partial sums.

    The conv is 3 accumulating MXU matmuls (one per kernel row ky) with K = 3*Cp each.
    Accumulation is f32; statistics come from the f32 accumulator before the bf16
    downcast of the stored conv intermediate.
    """
    _, Hp, Wp, Cp = xp_ref.shape
    H, W = Hp - 2, Wp - 2

    acc = None
    for ky in range(3):
        # ky offsets are along the outer (non-sublane) axis of the block: free slices.
        # TODO(synk): the kx=1,2 taps are offset-sublane slices (relayout copies); move
        # them to pltpu.roll on the XLU once the rotate direction is validated on HW.
        taps = [xp_ref[0, ky:ky + H, kx:kx + W, :] for kx in range(3)]
        slab = jnp.concatenate(taps, axis=-1).reshape(H * W, 3 * Cp)
        slab = slab.astype(jnp.bfloat16)                       # MXU-native operand
        part = jnp.dot(slab, w_ref[ky], preferred_element_type=jnp.float32)
        acc = part if acc is None else acc + part

    conv_ref[0] = acc.astype(conv_ref.dtype)                   # bf16 intermediate

    s = jnp.sum(acc, axis=0, keepdims=True)                    # (1, Cp)
    ss = jnp.sum(acc * acc, axis=0, keepdims=True)             # (1, Cp)
    stats_ref[0] = jnp.concatenate([s, ss], axis=0)            # (2, Cp) f32 partials


def _bn_relu_add_kernel(conv_ref, res_ref, scale_ref, shift_ref, o_ref):
    """Pass 2: folded BN (single FMA) + ReLU + residual add on lane-dense 2-D slabs."""
    c = conv_ref[0].astype(jnp.float32)                        # (TM, Cp)
    y = jnp.maximum(c * scale_ref[...] + shift_ref[...], 0.0) + res_ref[0]
    o_ref[0] = y


def resblock_forward(x_nchw, weight_oihw, gamma, beta):
    """x_nchw: (N, C, H, W) f32; weight_oihw: (C, C, 3, 3); gamma/beta: (C,)."""
    N, C, H, W = x_nchw.shape
    Cp = pl.cdiv(C, LANES) * LANES

    # ------------------------------ layout glue -------------------------------------
    # TODO(synk): accept/emit NHWC directly to drop these transposes; each is a full
    # HBM pass done by XLA outside the kernels.
    x_nhwc = jnp.transpose(x_nchw, (0, 2, 3, 1)).astype(jnp.float32)

    # Conv input: spatial + channel pad merged into ONE pad op (f32; the bf16 cast of
    # the matmul operand happens on the in-VMEM slab inside the kernel).
    x_pad = jnp.pad(x_nhwc, ((0, 0), (1, 1), (1, 1), (0, Cp - C)))

    # Residual: channel pad only, kept f32 for an exact "+ x", flattened to 2-D so the
    # pass-2 blocks are lane-dense slabs (unmasked stores, no per-tile reshape).
    x_res = jnp.pad(x_nhwc, ((0, 0), (0, 0), (0, 0), (0, Cp - C))).reshape(N, H * W, Cp)

    # (Cout, Cin, 3, 3) -> (ky, kx, Cin, Cout), zero-pad channels, group by ky:
    # w_mat[ky] is the (3*Cp, Cp) matrix for kernel row ky (row index = kx*Cp + cin).
    w_taps = jnp.transpose(weight_oihw, (2, 3, 1, 0)).astype(jnp.float32)
    w_taps = jnp.pad(w_taps, ((0, 0), (0, 0), (0, Cp - C), (0, Cp - C)))
    w_mat = w_taps.reshape(3, 3 * Cp, Cp).astype(jnp.bfloat16)

    # Zero-padded gamma/beta keep the padded output channels exactly zero
    # (scale = shift = 0) -- keep this invariant if refactoring the padding.
    gamma_p = jnp.pad(gamma.astype(jnp.float32), (0, Cp - C))
    beta_p = jnp.pad(beta.astype(jnp.float32), (0, Cp - C))

    # ------------------ pass 1: conv + per-image BN partial sums --------------------
    # Whole (small) padded images are Blocked inputs, so the fetch of image n+1 is
    # auto double-buffered behind image n's matmuls.
    # TODO(synk): for large images re-introduce row tiles with a manually
    # double-buffered halo DMA; at this size the whole image is the best "row tile".
    conv, stats = pl.pallas_call(
        _conv_stats_kernel,
        out_shape=(
            jax.ShapeDtypeStruct((N, H * W, Cp), jnp.bfloat16),   # conv intermediate
            jax.ShapeDtypeStruct((N, 2, Cp), jnp.float32),        # per-image sum/sumsq
        ),
        grid=(N,),
        in_specs=[
            pl.BlockSpec((1, H + 2, W + 2, Cp), lambda n: (n, 0, 0, 0)),
            pl.BlockSpec((3, 3 * Cp, Cp), lambda n: (0, 0, 0)),
        ],
        out_specs=(
            pl.BlockSpec((1, H * W, Cp), lambda n: (n, 0, 0)),
            pl.BlockSpec((1, 2, Cp), lambda n: (n, 0, 0)),
        ),
        compiler_params=pltpu.CompilerParams(
            dimension_semantics=("parallel",),     # no cross-image carry -> megacore OK
            vmem_limit_bytes=VMEM_LIMIT),
    )(x_pad, w_mat)

    # ------------- tiny global reduction + folded BN (scale / shift) ----------------
    sums = jnp.sum(stats, axis=0)                             # (2, Cp)
    m = float(N * H * W)
    mean = sums[0] / m
    var = jnp.maximum(sums[1] / m - mean * mean, 0.0)         # biased (training-mode BN)
    scale = gamma_p * lax.rsqrt(var + EPS)
    shift = beta_p - mean * scale

    # ----------------- pass 2: normalize + ReLU + residual add ----------------------
    TM = H * W
    for cand in (2048, 1024, 512, 256, 128, 64, 32, 16, 8):   # largest divisor tile
        if (H * W) % cand == 0:
            TM = cand
            break
    T2 = (H * W) // TM

    out2d = pl.pallas_call(
        _bn_relu_add_kernel,
        out_shape=jax.ShapeDtypeStruct((N, H * W, Cp), jnp.float32),
        grid=(N, T2),
        in_specs=[
            pl.BlockSpec((1, TM, Cp), lambda n, t: (n, t, 0)),     # conv (bf16)
            pl.BlockSpec((1, TM, Cp), lambda n, t: (n, t, 0)),     # residual (f32)
            pl.BlockSpec((1, Cp), lambda n, t: (0, 0)),            # folded scale
            pl.BlockSpec((1, Cp), lambda n, t: (0, 0)),            # folded shift
        ],
        out_specs=pl.BlockSpec((1, TM, Cp), lambda n, t: (n, t, 0)),
        compiler_params=pltpu.CompilerParams(
            dimension_semantics=("parallel", "parallel"),
            vmem_limit_bytes=VMEM_LIMIT),
    )(conv, x_res, scale.reshape(1, Cp), shift.reshape(1, Cp))

    # Drop channel padding, back to NCHW (the reshape is metadata-only in XLA).
    out = out2d.reshape(N, H, W, Cp)[..., :C]
    return jnp.transpose(out, (0, 3, 1, 2))


def _reference(x_nchw, weight_oihw, gamma, beta):
    """Pure-JAX reference mirroring the PyTorch forward (training-mode BN), f32."""
    conv = lax.conv_general_dilated(
        x_nchw, weight_oihw, window_strides=(1, 1), padding="SAME",
        dimension_numbers=("NCHW", "OIHW", "NCHW"),
        precision=lax.Precision.HIGHEST)
    mean = conv.mean(axis=(0, 2, 3), keepdims=True)
    var = ((conv - mean) ** 2).mean(axis=(0, 2, 3), keepdims=True)
    g = gamma.reshape(1, -1, 1, 1)
    b = beta.reshape(1, -1, 1, 1)
    bn = (conv - mean) * g * lax.rsqrt(var + EPS) + b
    return jnp.maximum(bn, 0.0) + x_nchw


if __name__ == "__main__":
    N, C, H, W = 2, 4, 16, 16

    key = jax.random.PRNGKey(0)
    kx_, kw_ = jax.random.split(key)

    x = jax.random.normal(kx_, (N, C, H, W), dtype=jnp.float32)

    # kaiming_normal_(nonlinearity='relu', mode='fan_in'): std = sqrt(2 / (C*3*3))
    fan_in = C * 3 * 3
    std = (2.0 / fan_in) ** 0.5
    conv_w = std * jax.random.normal(kw_, (C, C, 3, 3), dtype=jnp.float32)

    bn_gamma = jnp.full((C,), 0.5, dtype=jnp.float32)   # constant_(weight, 0.5)
    bn_beta = jnp.zeros((C,), dtype=jnp.float32)        # zeros_(bias)

    fwd = jax.jit(resblock_forward)
    out = jax.block_until_ready(fwd(x, conv_w, bn_gamma, bn_beta))
    ref = jax.block_until_ready(_reference(x, conv_w, bn_gamma, bn_beta))

    assert out.shape == (N, C, H, W)
    max_err = float(jnp.max(jnp.abs(out - ref)))
    # bf16 MXU operands + bf16 conv intermediate vs. an f32 reference => relaxed tol.
    assert max_err < 3e-2, f"max abs error {max_err}"

    print("KERNEL_OK")
</pallas_src>

<mosaic_0001>
module attributes {stable_mosaic.version = 11 : i64} {
  func.func @_conv_stats_kernel(%arg0: i32, %arg1: memref<1x18x18x128xf32, #tpu.memory_space<vmem>>, %arg2: memref<3x384x128xbf16, #tpu.memory_space<vmem>>, %arg3: memref<1x256x128xbf16, #tpu.memory_space<vmem>>, %arg4: memref<1x2x128xf32, #tpu.memory_space<vmem>>) attributes {dimension_semantics = [#tpu.dimension_semantics<parallel>], iteration_bounds = array<i64: 2>, scalar_prefetch = 0 : i64, scratch_operands = 0 : i64, tpu.core_type = #tpu.core_type<tc>, window_params = [{transform_indices = @transform_0, window_bounds = array<i64: 1, 18, 18, 128>}, {pipeline_mode = #tpu.pipeline_mode<synchronous>, transform_indices = @transform_1, window_bounds = array<i64: 3, 384, 128>}, {transform_indices = @transform_2, window_bounds = array<i64: 1, 256, 128>}, {transform_indices = @transform_3, window_bounds = array<i64: 1, 2, 128>}]} {
    %c0 = arith.constant 0 : index
    %c0_0 = arith.constant 0 : index
    %c0_1 = arith.constant 0 : index
    %c0_2 = arith.constant 0 : index
    %0 = vector.load %arg1[%c0, %c0_0, %c0_1, %c0_2] : memref<1x18x18x128xf32, #tpu.memory_space<vmem>>, vector<1x16x16x128xf32>
    %1 = vector.shape_cast %0 : vector<1x16x16x128xf32> to vector<16x16x128xf32>
    %c0_3 = arith.constant 0 : index
    %c0_4 = arith.constant 0 : index
    %c1 = arith.constant 1 : index
    %c0_5 = arith.constant 0 : index
    %2 = vector.load %arg1[%c0_3, %c0_4, %c1, %c0_5] : memref<1x18x18x128xf32, #tpu.memory_space<vmem>>, vector<1x16x16x128xf32>
    %3 = vector.shape_cast %2 : vector<1x16x16x128xf32> to vector<16x16x128xf32>
    %c0_6 = arith.constant 0 : index
    %c0_7 = arith.constant 0 : index
    %c2 = arith.constant 2 : index
    %c0_8 = arith.constant 0 : index
    %4 = vector.load %arg1[%c0_6, %c0_7, %c2, %c0_8] : memref<1x18x18x128xf32, #tpu.memory_space<vmem>>, vector<1x16x16x128xf32>
    %5 = vector.shape_cast %4 : vector<1x16x16x128xf32> to vector<16x16x128xf32>
    %6 = tpu.concatenate %1, %3, %5 in 2 : vector<16x16x128xf32>, vector<16x16x128xf32>, vector<16x16x128xf32> -> vector<16x16x384xf32>
    %7 = vector.shape_cast %6 : vector<16x16x384xf32> to vector<256x384xf32>
    %8 = arith.truncf %7 : vector<256x384xf32> to vector<256x384xbf16>
    %c0_9 = arith.constant 0 : index
    %c0_10 = arith.constant 0 : index
    %c0_11 = arith.constant 0 : index
    %9 = vector.load %arg2[%c0_9, %c0_10, %c0_11] : memref<3x384x128xbf16, #tpu.memory_space<vmem>>, vector<1x384x128xbf16>
    %10 = vector.shape_cast %9 : vector<1x384x128xbf16> to vector<384x128xbf16>
    %cst = arith.constant dense<0.000000e+00> : vector<256x128xf32>
    %11 = tpu.matmul %8, %10, %cst {dimension_numbers = #tpu.dot_dimension_numbers<[1], [0], [0], [1], [0, 0, 1, 1], [], []>} : vector<256x384xbf16>, vector<384x128xbf16>, vector<256x128xf32> -> vector<256x128xf32>
    %c0_12 = arith.constant 0 : index
    %c1_13 = arith.constant 1 : index
    %c0_14 = arith.constant 0 : index
    %c0_15 = arith.constant 0 : index
    %12 = vector.load %arg1[%c0_12, %c1_13, %c0_14, %c0_15] : memref<1x18x18x128xf32, #tpu.memory_space<vmem>>, vector<1x16x16x128xf32>
    %13 = vector.shape_cast %12 : vector<1x16x16x128xf32> to vector<16x16x128xf32>
    %c0_16 = arith.constant 0 : index
    %c1_17 = arith.constant 1 : index
    %c1_18 = arith.constant 1 : index
    %c0_19 = arith.constant 0 : index
    %14 = vector.load %arg1[%c0_16, %c1_17, %c1_18, %c0_19] : memref<1x18x18x128xf32, #tpu.memory_space<vmem>>, vector<1x16x16x128xf32>
    %15 = vector.shape_cast %14 : vector<1x16x16x128xf32> to vector<16x16x128xf32>
    %c0_20 = arith.constant 0 : index
    %c1_21 = arith.constant 1 : index
    %c2_22 = arith.constant 2 : index
    %c0_23 = arith.constant 0 : index
    %16 = vector.load %arg1[%c0_20, %c1_21, %c2_22, %c0_23] : memref<1x18x18x128xf32, #tpu.memory_space<vmem>>, vector<1x16x16x128xf32>
    %17 = vector.shape_cast %16 : vector<1x16x16x128xf32> to vector<16x16x128xf32>
    %18 = tpu.concatenate %13, %15, %17 in 2 : vector<16x16x128xf32>, vector<16x16x128xf32>, vector<16x16x128xf32> -> vector<16x16x384xf32>
    %19 = vector.shape_cast %18 : vector<16x16x384xf32> to vector<256x384xf32>
    %20 = arith.truncf %19 : vector<256x384xf32> to vector<256x384xbf16>
    %c1_24 = arith.constant 1 : index
    %c0_25 = arith.constant 0 : index
    %c0_26 = arith.constant 0 : index
    %21 = vector.load %arg2[%c1_24, %c0_25, %c0_26] : memref<3x384x128xbf16, #tpu.memory_space<vmem>>, vector<1x384x128xbf16>
    %22 = vector.shape_cast %21 : vector<1x384x128xbf16> to vector<384x128xbf16>
    %cst_27 = arith.constant dense<0.000000e+00> : vector<256x128xf32>
    %23 = tpu.matmul %20, %22, %cst_27 {dimension_numbers = #tpu.dot_dimension_numbers<[1], [0], [0], [1], [0, 0, 1, 1], [], []>} : vector<256x384xbf16>, vector<384x128xbf16>, vector<256x128xf32> -> vector<256x128xf32>
    %24 = arith.addf %11, %23 : vector<256x128xf32>
    %c0_28 = arith.constant 0 : index
    %c2_29 = arith.constant 2 : index
    %c0_30 = arith.constant 0 : index
    %c0_31 = arith.constant 0 : index
    %25 = vector.load %arg1[%c0_28, %c2_29, %c0_30, %c0_31] : memref<1x18x18x128xf32, #tpu.memory_space<vmem>>, vector<1x16x16x128xf32>
    %26 = vector.shape_cast %25 : vector<1x16x16x128xf32> to vector<16x16x128xf32>
    %c0_32 = arith.constant 0 : index
    %c2_33 = arith.constant 2 : index
    %c1_34 = arith.constant 1 : index
    %c0_35 = arith.constant 0 : index
    %27 = vector.load %arg1[%c0_32, %c2_33, %c1_34, %c0_35] : memref<1x18x18x128xf32, #tpu.memory_space<vmem>>, vector<1x16x16x128xf32>
    %28 = vector.shape_cast %27 : vector<1x16x16x128xf32> to vector<16x16x128xf32>
    %c0_36 = arith.constant 0 : index
    %c2_37 = arith.constant 2 : index
    %c2_38 = arith.constant 2 : index
    %c0_39 = arith.constant 0 : index
    %29 = vector.load %arg1[%c0_36, %c2_37, %c2_38, %c0_39] : memref<1x18x18x128xf32, #tpu.memory_space<vmem>>, vector<1x16x16x128xf32>
    %30 = vector.shape_cast %29 : vector<1x16x16x128xf32> to vector<16x16x128xf32>
    %31 = tpu.concatenate %26, %28, %30 in 2 : vector<16x16x128xf32>, vector<16x16x128xf32>, vector<16x16x128xf32> -> vector<16x16x384xf32>
    %32 = vector.shape_cast %31 : vector<16x16x384xf32> to vector<256x384xf32>
    %33 = arith.truncf %32 : vector<256x384xf32> to vector<256x384xbf16>
    %c2_40 = arith.constant 2 : index
    %c0_41 = arith.constant 0 : index
    %c0_42 = arith.constant 0 : index
    %34 = vector.load %arg2[%c2_40, %c0_41, %c0_42] : memref<3x384x128xbf16, #tpu.memory_space<vmem>>, vector<1x384x128xbf16>
    %35 = vector.shape_cast %34 : vector<1x384x128xbf16> to vector<384x128xbf16>
    %cst_43 = arith.constant dense<0.000000e+00> : vector<256x128xf32>
    %36 = tpu.matmul %33, %35, %cst_43 {dimension_numbers = #tpu.dot_dimension_numbers<[1], [0], [0], [1], [0, 0, 1, 1], [], []>} : vector<256x384xbf16>, vector<384x128xbf16>, vector<256x128xf32> -> vector<256x128xf32>
    %37 = arith.addf %24, %36 : vector<256x128xf32>
    %38 = arith.truncf %37 : vector<256x128xf32> to vector<256x128xbf16>
    %c0_44 = arith.constant 0 : index
    %c0_45 = arith.constant 0 : index
    %c0_46 = arith.constant 0 : index
    %39 = vector.load %arg3[%c0_44, %c0_45, %c0_46] : memref<1x256x128xbf16, #tpu.memory_space<vmem>>, vector<1x256x128xbf16>
    %40 = vector.shape_cast %39 : vector<1x256x128xbf16> to vector<256x128xbf16>
    %41 = vector.shape_cast %38 : vector<256x128xbf16> to vector<1x256x128xbf16>
    tpu.vector_store %arg3[%c0_44, %c0_45, %c0_46], %41 {strides = array<i32>} : memref<1x256x128xbf16, #tpu.memory_space<vmem>>, vector<1x256x128xbf16>,
    %cst_47 = arith.constant dense<0.000000e+00> : vector<128xf32>
    %42 = vector.multi_reduction <add>, %37, %cst_47 [0] : vector<256x128xf32> to vector<128xf32>
    %43 = vector.shape_cast %42 : vector<128xf32> to vector<1x128xf32>
    %44 = arith.mulf %37, %37 : vector<256x128xf32>
    %cst_48 = arith.constant dense<0.000000e+00> : vector<128xf32>
    %45 = vector.multi_reduction <add>, %44, %cst_48 [0] : vector<256x128xf32> to vector<128xf32>
    %46 = vector.shape_cast %45 : vector<128xf32> to vector<1x128xf32>
    %47 = tpu.concatenate %43, %46 in 0 : vector<1x128xf32>, vector<1x128xf32> -> vector<2x128xf32>
    %c0_49 = arith.constant 0 : index
    %c0_50 = arith.constant 0 : index
    %c0_51 = arith.constant 0 : index
    %48 = vector.load %arg4[%c0_49, %c0_50, %c0_51] : memref<1x2x128xf32, #tpu.memory_space<vmem>>, vector<1x2x128xf32>
    %49 = vector.shape_cast %48 : vector<1x2x128xf32> to vector<2x128xf32>
    %50 = vector.shape_cast %47 : vector<2x128xf32> to vector<1x2x128xf32>
    tpu.vector_store %arg4[%c0_49, %c0_50, %c0_51], %50 {strides = array<i32>} : memref<1x2x128xf32, #tpu.memory_space<vmem>>, vector<1x2x128xf32>,
    return
  }
  func.func @transform_0(%arg0: i32) -> (i32, i32, i32, i32) {
    %c0_i32 = arith.constant 0 : i32
    %c0_i32_0 = arith.constant 0 : i32
    %c0_i32_1 = arith.constant 0 : i32
    %c0_i32_2 = arith.constant 0 : i32
    return %arg0, %c0_i32, %c0_i32_0, %c0_i32_1 : i32, i32, i32, i32
  }
  func.func @transform_1(%arg0: i32) -> (i32, i32, i32) {
    %c0_i32 = arith.constant 0 : i32
    %c0_i32_0 = arith.constant 0 : i32
    %c0_i32_1 = arith.constant 0 : i32
    %c0_i32_2 = arith.constant 0 : i32
    return %c0_i32, %c0_i32_0, %c0_i32_1 : i32, i32, i32
  }
  func.func @transform_2(%arg0: i32) -> (i32, i32, i32) {
    %c0_i32 = arith.constant 0 : i32
    %c0_i32_0 = arith.constant 0 : i32
    %c0_i32_1 = arith.constant 0 : i32
    return %arg0, %c0_i32, %c0_i32_0 : i32, i32, i32
  }
  func.func @transform_3(%arg0: i32) -> (i32, i32, i32) {
    %c0_i32 = arith.constant 0 : i32
    %c0_i32_0 = arith.constant 0 : i32
    %c0_i32_1 = arith.constant 0 : i32
    return %arg0, %c0_i32, %c0_i32_0 : i32, i32, i32
  }
}

module attributes {stable_mosaic.version = 11 : i64} {
  func.func @_bn_relu_add_kernel(%arg0: i32, %arg1: i32, %arg2: memref<1x256x128xbf16, #tpu.memory_space<vmem>>, %arg3: memref<1x256x128xf32, #tpu.memory_space<vmem>>, %arg4: memref<1x128xf32, #tpu.memory_space<vmem>>, %arg5: memref<1x128xf32, #tpu.memory_space<vmem>>, %arg6: memref<1x256x128xf32, #tpu.memory_space<vmem>>) attributes {dimension_semantics = [#tpu.dimension_semantics<parallel>, #tpu.dimension_semantics<parallel>], iteration_bounds = array<i64: 2, 1>, scalar_prefetch = 0 : i64, scratch_operands = 0 : i64, tpu.core_type = #tpu.core_type<tc>, window_params = [{transform_indices = @transform_0, window_bounds = array<i64: 1, 256, 128>}, {transform_indices = @transform_1, window_bounds = array<i64: 1, 256, 128>}, {pipeline_mode = #tpu.pipeline_mode<synchronous>, transform_indices = @transform_2, window_bounds = array<i64: 1, 128>}, {pipeline_mode = #tpu.pipeline_mode<synchronous>, transform_indices = @transform_3, window_bounds = array<i64: 1, 128>}, {transform_indices = @transform_4, window_bounds = array<i64: 1, 256, 128>}]} {
    %c0 = arith.constant 0 : index
    %c0_0 = arith.constant 0 : index
    %c0_1 = arith.constant 0 : index
    %0 = vector.load %arg2[%c0, %c0_0, %c0_1] : memref<1x256x128xbf16, #tpu.memory_space<vmem>>, vector<1x256x128xbf16>
    %1 = vector.shape_cast %0 : vector<1x256x128xbf16> to vector<256x128xbf16>
    %2 = arith.extf %1 : vector<256x128xbf16> to vector<256x128xf32>
    %c0_2 = arith.constant 0 : index
    %c0_3 = arith.constant 0 : index
    %3 = vector.load %arg4[%c0_2, %c0_3] : memref<1x128xf32, #tpu.memory_space<vmem>>, vector<1x128xf32>
    %4 = vector.broadcast %3 : vector<1x128xf32> to vector<256x128xf32>
    %5 = arith.mulf %2, %4 : vector<256x128xf32>
    %c0_4 = arith.constant 0 : index
    %c0_5 = arith.constant 0 : index
    %6 = vector.load %arg5[%c0_4, %c0_5] : memref<1x128xf32, #tpu.memory_space<vmem>>, vector<1x128xf32>
    %7 = vector.broadcast %6 : vector<1x128xf32> to vector<256x128xf32>
    %8 = arith.addf %5, %7 : vector<256x128xf32>
    %cst = arith.constant 0.000000e+00 : f32
    %9 = vector.broadcast %cst : f32 to vector<256x128xf32>
    %10 = arith.maximumf %8, %9 : vector<256x128xf32>
    %c0_6 = arith.constant 0 : index
    %c0_7 = arith.constant 0 : index
    %c0_8 = arith.constant 0 : index
    %11 = vector.load %arg3[%c0_6, %c0_7, %c0_8] : memref<1x256x128xf32, #tpu.memory_space<vmem>>, vector<1x256x128xf32>
    %12 = vector.shape_cast %11 : vector<1x256x128xf32> to vector<256x128xf32>
    %13 = arith.addf %10, %12 : vector<256x128xf32>
    %c0_9 = arith.constant 0 : index
    %c0_10 = arith.constant 0 : index
    %c0_11 = arith.constant 0 : index
    %14 = vector.load %arg6[%c0_9, %c0_10, %c0_11] : memref<1x256x128xf32, #tpu.memory_space<vmem>>, vector<1x256x128xf32>
    %15 = vector.shape_cast %14 : vector<1x256x128xf32> to vector<256x128xf32>
    %16 = vector.shape_cast %13 : vector<256x128xf32> to vector<1x256x128xf32>
    tpu.vector_store %arg6[%c0_9, %c0_10, %c0_11], %16 {strides = array<i32>} : memref<1x256x128xf32, #tpu.memory_space<vmem>>, vector<1x256x128xf32>,
    return
  }
  func.func @transform_0(%arg0: i32, %arg1: i32) -> (i32, i32, i32) {
    %c0_i32 = arith.constant 0 : i32
    %c0_i32_0 = arith.constant 0 : i32
    return %arg0, %arg1, %c0_i32 : i32, i32, i32
  }
  func.func @transform_1(%arg0: i32, %arg1: i32) -> (i32, i32, i32) {
    %c0_i32 = arith.constant 0 : i32
    %c0_i32_0 = arith.constant 0 : i32
    return %arg0, %arg1, %c0_i32 : i32, i32, i32
  }
  func.func @transform_2(%arg0: i32, %arg1: i32) -> (i32, i32) {
    %c0_i32 = arith.constant 0 : i32
    %c0_i32_0 = arith.constant 0 : i32
    %c0_i32_1 = arith.constant 0 : i32
    return %c0_i32, %c0_i32_0 : i32, i32
  }
  func.func @transform_3(%arg0: i32, %arg1: i32) -> (i32, i32) {
    %c0_i32 = arith.constant 0 : i32
    %c0_i32_0 = arith.constant 0 : i32
    %c0_i32_1 = arith.constant 0 : i32
    return %c0_i32, %c0_i32_0 : i32, i32
  }
  func.func @transform_4(%arg0: i32, %arg1: i32) -> (i32, i32, i32) {
    %c0_i32 = arith.constant 0 : i32
    %c0_i32_0 = arith.constant 0 : i32
    return %arg0, %arg1, %c0_i32 : i32, i32, i32
  }
}

</mosaic_0001>

<bundles_post_ra>
// kernel: resblock_forward.3
= control target key start
LH: loop header
LB: loop body
LE: loop exit
PB: predicated region body
PF: predicated region fallthrough
CT: control target
= control target key end

     0   :  { %s812_s15 = smov 0   ;;  %s814_s16 = smov 0   ;;  %s1016_s0 = inlined_call_operand.vmem [shape: bf16[2,256,128], index: 0, kind: input, shape index: {}]   ;;  %s1017_s1 = inlined_call_operand.vmem [shape: f32[2,256,128], index: 1, kind: input, shape index: {}]   ;;  %s1018_s2 = inlined_call_operand.vmem [shape: f32[1,128], index: 2, kind: input, shape index: {}]   ;;  %s1019_s3 = inlined_call_operand.vmem [shape: f32[1,128], index: 3, kind: input, shape index: {}]   ;;  %s1020_s4 = inlined_call_operand.vmem [shape: f32[2,256,128], index: 4, kind: output, shape index: {}]  }
   0x1   :  { %s816_s17 = smov 0  }
   0x2 LB: > { %s26_s18 = sadd.s32 1, %s781_s16  ;;  %p646_p0 = scmp.ge.s32.totalorder %s785_s17, 1  ;;  %s785_s17 = sphi %s816_s17, %s14_s17   ;;  %s781_s16 = sphi %s814_s16, %s1022_s16   ;;  %s777_s15 = sphi %s812_s15, %s1021_s15  }
   0x3   : > { %p28_p1 = scmp.ge.s32.totalorder %s26_s18, 2  ;;  %p200_p2 = scmp.lt.s32.totalorder %s785_s17, 3 }
   0x5   : > { %s1024_s18 = smov (%p28_p1, %s26_s18), 0  ;;  %p201_p3 = pnand %p646_p0, %p200_p2 }
   0x6   : > { %p244_p4 = scmp.lt.s32.totalorder (!%p201_p3), %s777_s15, 1 }
   0x7   : > { %204 = sbr.rel (%p201_p3) target bundleno = 63 (0x3f), region = 36 }
   0xc   : > { %s1026_s15 = smov (!%p244_p4, %s777_s15), 1  ;;  %v841_v0 = vld [vmem:[%s1018_s2] ss:$0 sm:$0xff] }
   0xd   : > { %s655_s19 = sshll.u32 %s1026_s15, 7  ;;  %s656_s25 = sshll.u32 %s1026_s15, 8  ;;  %v848_v3 = vld [vmem:[%s1019_s3] ss:$0 sm:$0xff] }
   0xe   : > { %s836_s22 = scalar_lea.vmem %s1016_s0, %s655_s19  ;;  %s857_s30 = scalar_lea.vmem %s1017_s1, %s656_s25 }
   0xf   : > { %v659_v1 = vld [vmem:[%s836_s22] sm:$0xff]   ;;  %v722_v5 = vld [vmem:[%s836_s22 + $0x8] sm:$0xff]   ;;  %v723_v8 = vld [vmem:[%s836_s22 + $0x10] sm:$0xff]   ;;  %s883_s7 = scalar_lea.vmem %s1020_s4, %s656_s25 }
  0x10   : > { %v660_v2 = vunpack.c.l.bf16 %v659_v1  ;;  %v661_v4 = vunpack.c.h.bf16 %v659_v1  ;;  %v664_v6 = vunpack.c.l.bf16 %v722_v5  ;;  %v665_v7 = vunpack.c.h.bf16 %v722_v5  ;;  %v724_v13 = vld [vmem:[%s836_s22 + $0x18] sm:$0xff]   ;;  %v441_v22 = vld [vmem:[%s857_s30] sm:$0xff]  ;;  %v442_v23 = vld [vmem:[%s857_s30 + $0x8] sm:$0xff] }
  0x11   : > { %v668_v11 = vunpack.c.l.bf16 %v723_v8  ;;  %v669_v12 = vunpack.c.h.bf16 %v723_v8  ;;  %v672_v16 = vunpack.c.l.bf16 %v724_v13  ;;  %v673_v17 = vunpack.c.h.bf16 %v724_v13  ;;  %v443_v30 = vld [vmem:[%s857_s30 + $0x10] sm:$0xff]  ;;  %v444_v31 = vld [vmem:[%s857_s30 + $0x18] sm:$0xff]  ;;  %v445_v36 = vld [vmem:[%s857_s30 + $0x20] sm:$0xff] }
  0x12   : > { %v341_v9 = vmul.f32 %v841_v0, %v660_v2  ;;  %v342_v10 = vmul.f32 %v841_v0, %v661_v4  ;;  %v343_v14 = vmul.f32 %v841_v0, %v664_v6  ;;  %v344_v15 = vmul.f32 %v841_v0, %v665_v7  ;;  %v446_v37 = vld [vmem:[%s857_s30 + $0x28] sm:$0xff]  ;;  %v725_v40 = vld [vmem:[%s836_s22 + $0x20] sm:$0xff]   ;;  %v447_v45 = vld [vmem:[%s857_s30 + $0x30] sm:$0xff] }
  0x13   : > { %v345_v20 = vmul.f32 %v841_v0, %v668_v11  ;;  %v346_v21 = vmul.f32 %v841_v0, %v669_v12  ;;  %v347_v26 = vmul.f32 %v841_v0, %v672_v16  ;;  %v348_v27 = vmul.f32 %v841_v0, %v673_v17  ;;  %v448_v46 = vld [vmem:[%s857_s30 + $0x38] sm:$0xff]  ;;  %v726_v47 = vld [vmem:[%s836_s22 + $0x28] sm:$0xff]   ;;  %v727_v52 = vld [vmem:[%s836_s22 + $0x30] sm:$0xff]  }
  0x14   : > { %v377_v18 = vadd.f32 %v848_v3, %v341_v9  ;;  %v378_v19 = vadd.f32 %v848_v3, %v342_v10  ;;  %v379_v24 = vadd.f32 %v848_v3, %v343_v14  ;;  %v380_v25 = vadd.f32 %v848_v3, %v344_v15  ;;  %v728_v57 = vld [vmem:[%s836_s22 + $0x38] sm:$0xff]   ;;  %v449_v12 = vld [vmem:[%s857_s30 + $0x40] sm:$0xff]  ;;  %v450_v13 = vld [vmem:[%s857_s30 + $0x48] sm:$0xff] }
  0x15   : > { %v381_v32 = vadd.f32 %v848_v3, %v345_v20  ;;  %v382_v33 = vadd.f32 %v848_v3, %v346_v21  ;;  %v383_v38 = vadd.f32 %v848_v3, %v347_v26  ;;  %v384_v39 = vadd.f32 %v848_v3, %v348_v27  ;;  %v451_v20 = vld [vmem:[%s857_s30 + $0x50] sm:$0xff]  ;;  %v452_v21 = vld [vmem:[%s857_s30 + $0x58] sm:$0xff]  ;;  %v453_v26 = vld [vmem:[%s857_s30 + $0x60] sm:$0xff] }
  0x16   : > { %v409_v28 = vmax.f32 %v377_v18, 0.0  ;;  %v410_v29 = vmax.f32 %v378_v19, 0.0  ;;  %v411_v34 = vmax.f32 %v379_v24, 0.0  ;;  %v412_v35 = vmax.f32 %v380_v25, 0.0  ;;  %v454_v27 = vld [vmem:[%s857_s30 + $0x68] sm:$0xff] }
  0x17   : > { %v413_v43 = vmax.f32 %v381_v32, 0.0  ;;  %v414_v44 = vmax.f32 %v382_v33, 0.0  ;;  %v415_v50 = vmax.f32 %v383_v38, 0.0  ;;  %v416_v51 = vmax.f32 %v384_v39, 0.0 }
  0x18   : > { %v473_v41 = vadd.f32 %v441_v22, %v409_v28  ;;  %v474_v42 = vadd.f32 %v442_v23, %v410_v29  ;;  %v475_v48 = vadd.f32 %v443_v30, %v411_v34  ;;  %v476_v49 = vadd.f32 %v444_v31, %v412_v35  ;;  %v729_v30 = vld [vmem:[%s836_s22 + $0x40] sm:$0xff]   ;;  %v455_v35 = vld [vmem:[%s857_s30 + $0x70] sm:$0xff] }
  0x19   : > { %v477_v53 = vadd.f32 %v445_v36, %v413_v43  ;;  %v478_v54 = vadd.f32 %v446_v37, %v414_v44  ;;  %v676_v55 = vunpack.c.l.bf16 %v725_v40  ;;  %v677_v56 = vunpack.c.h.bf16 %v725_v40  ;;  %v456_v36 = vld [vmem:[%s857_s30 + $0x78] sm:$0xff]  ;;  %v730_v37 = vld [vmem:[%s836_s22 + $0x48] sm:$0xff]  }
  0x1a   : > { %505 = vst [vmem:[%s883_s7] sm:$0xff] %v473_v41  ;;  %v479_v58 = vadd.f32 %v447_v45, %v415_v50  ;;  %v480_v59 = vadd.f32 %v448_v46, %v416_v51  ;;  %v680_v60 = vunpack.c.l.bf16 %v726_v47  ;;  %v681_v61 = vunpack.c.h.bf16 %v726_v47  ;;  %v732_v47 = vld [vmem:[%s836_s22 + $0x58] sm:$0xff]  }
  0x1b   : > { %506 = vst [vmem:[%s883_s7 + $0x8] sm:$0xff] %v474_v42  ;;  %v349_v62 = vmul.f32 %v841_v0, %v676_v55  ;;  %v350_v63 = vmul.f32 %v841_v0, %v677_v56  ;;  %v684_v1 = vunpack.c.l.bf16 %v727_v52  ;;  %v685_v2 = vunpack.c.h.bf16 %v727_v52  ;;  %v731_v42 = vld [vmem:[%s836_s22 + $0x50] sm:$0xff]  }
  0x1c   : > { %507 = vst [vmem:[%s883_s7 + $0x10] sm:$0xff] %v475_v48  ;;  %v351_v4 = vmul.f32 %v841_v0, %v680_v60  ;;  %v352_v5 = vmul.f32 %v841_v0, %v681_v61  ;;  %v688_v6 = vunpack.c.l.bf16 %v728_v57  ;;  %v689_v7 = vunpack.c.h.bf16 %v728_v57 }
  0x1d   : > { %508 = vst [vmem:[%s883_s7 + $0x18] sm:$0xff] %v476_v49  ;;  %v385_v8 = vadd.f32 %v848_v3, %v349_v62  ;;  %v386_v9 = vadd.f32 %v848_v3, %v350_v63  ;;  %v353_v10 = vmul.f32 %v841_v0, %v684_v1  ;;  %v354_v11 = vmul.f32 %v841_v0, %v685_v2  ;;  %v457_v1 = vld [vmem:[%s857_s30 + $0x80] sm:$0xff]  ;;  %v458_v2 = vld [vmem:[%s857_s30 + $0x88] sm:$0xff] }
  0x1e   : > { %509 = vst [vmem:[%s883_s7 + $0x20] sm:$0xff] %v477_v53  ;;  %v387_v14 = vadd.f32 %v848_v3, %v351_v4  ;;  %v388_v15 = vadd.f32 %v848_v3, %v352_v5  ;;  %v355_v16 = vmul.f32 %v841_v0, %v688_v6  ;;  %v356_v17 = vmul.f32 %v841_v0, %v689_v7 }
  0x1f   : > { %510 = vst [vmem:[%s883_s7 + $0x28] sm:$0xff] %v478_v54  ;;  %v417_v18 = vmax.f32 %v385_v8, 0.0  ;;  %v418_v19 = vmax.f32 %v386_v9, 0.0  ;;  %v389_v22 = vadd.f32 %v848_v3, %v353_v10  ;;  %v390_v23 = vadd.f32 %v848_v3, %v354_v11  ;;  %v459_v10 = vld [vmem:[%s857_s30 + $0x90] sm:$0xff]  ;;  %v460_v11 = vld [vmem:[%s857_s30 + $0x98] sm:$0xff] }
  0x20   : > { %511 = vst [vmem:[%s883_s7 + $0x30] sm:$0xff] %v479_v58  ;;  %v419_v24 = vmax.f32 %v387_v14, 0.0  ;;  %v420_v25 = vmax.f32 %v388_v15, 0.0  ;;  %v391_v28 = vadd.f32 %v848_v3, %v355_v16  ;;  %v392_v29 = vadd.f32 %v848_v3, %v356_v17  ;;  %v461_v16 = vld [vmem:[%s857_s30 + $0xa0] sm:$0xff]  ;;  %v462_v17 = vld [vmem:[%s857_s30 + $0xa8] sm:$0xff] }
  0x21   : > { %512 = vst [vmem:[%s883_s7 + $0x38] sm:$0xff] %v480_v59  ;;  %v481_v31 = vadd.f32 %v449_v12, %v417_v18  ;;  %v482_v32 = vadd.f32 %v450_v13, %v418_v19  ;;  %v421_v33 = vmax.f32 %v389_v22, 0.0  ;;  %v422_v34 = vmax.f32 %v390_v23, 0.0 }
  0x22   : > { %v483_v38 = vadd.f32 %v451_v20, %v419_v24  ;;  %v484_v39 = vadd.f32 %v452_v21, %v420_v25  ;;  %v423_v40 = vmax.f32 %v391_v28, 0.0  ;;  %v424_v41 = vmax.f32 %v392_v29, 0.0  ;;  %v733_v20 = vld [vmem:[%s836_s22 + $0x60] sm:$0xff]   ;;  %v463_v25 = vld [vmem:[%s857_s30 + $0xb0] sm:$0xff] }
  0x23   : > { %513 = vst [vmem:[%s883_s7 + $0x40] sm:$0xff] %v481_v31  ;;  %v485_v43 = vadd.f32 %v453_v26, %v421_v33  ;;  %v486_v44 = vadd.f32 %v454_v27, %v422_v34  ;;  %v692_v45 = vunpack.c.l.bf16 %v729_v30  ;;  %v693_v46 = vunpack.c.h.bf16 %v729_v30  ;;  %v464_v26 = vld [vmem:[%s857_s30 + $0xb8] sm:$0xff]  ;;  %v734_v27 = vld [vmem:[%s836_s22 + $0x68] sm:$0xff]  }
  0x24   : > { %514 = vst [vmem:[%s883_s7 + $0x48] sm:$0xff] %v482_v32  ;;  %v487_v48 = vadd.f32 %v455_v35, %v423_v40  ;;  %v488_v49 = vadd.f32 %v456_v36, %v424_v41  ;;  %v696_v50 = vunpack.c.l.bf16 %v730_v37  ;;  %v697_v51 = vunpack.c.h.bf16 %v730_v37  ;;  %v735_v32 = vld [vmem:[%s836_s22 + $0x70] sm:$0xff]   ;;  %v736_v37 = vld [vmem:[%s836_s22 + $0x78] sm:$0xff]  }
  0x25   : > { %515 = vst [vmem:[%s883_s7 + $0x50] sm:$0xff] %v483_v38  ;;  %v357_v52 = vmul.f32 %v841_v0, %v692_v45  ;;  %v358_v53 = vmul.f32 %v841_v0, %v693_v46  ;;  %v700_v54 = vunpack.c.l.bf16 %v731_v42  ;;  %v701_v55 = vunpack.c.h.bf16 %v731_v42 }
  0x26   : > { %516 = vst [vmem:[%s883_s7 + $0x58] sm:$0xff] %v484_v39  ;;  %v359_v56 = vmul.f32 %v841_v0, %v696_v50  ;;  %v360_v57 = vmul.f32 %v841_v0, %v697_v51  ;;  %v704_v58 = vunpack.c.l.bf16 %v732_v47  ;;  %v705_v59 = vunpack.c.h.bf16 %v732_v47 }
  0x27   : > { %517 = vst [vmem:[%s883_s7 + $0x60] sm:$0xff] %v485_v43  ;;  %v393_v60 = vadd.f32 %v848_v3, %v357_v52  ;;  %v394_v61 = vadd.f32 %v848_v3, %v358_v53  ;;  %v361_v62 = vmul.f32 %v841_v0, %v700_v54  ;;  %v362_v63 = vmul.f32 %v841_v0, %v701_v55  ;;  %v465_v54 = vld [vmem:[%s857_s30 + $0xc0] sm:$0xff]  ;;  %v466_v55 = vld [vmem:[%s857_s30 + $0xc8] sm:$0xff] }
  0x28   : > { %518 = vst [vmem:[%s883_s7 + $0x68] sm:$0xff] %v486_v44  ;;  %v395_v4 = vadd.f32 %v848_v3, %v359_v56  ;;  %v396_v5 = vadd.f32 %v848_v3, %v360_v57  ;;  %v363_v6 = vmul.f32 %v841_v0, %v704_v58  ;;  %v364_v7 = vmul.f32 %v841_v0, %v705_v59 }
  0x29   : > { %519 = vst [vmem:[%s883_s7 + $0x70] sm:$0xff] %v487_v48  ;;  %v425_v8 = vmax.f32 %v393_v60, 0.0  ;;  %v426_v9 = vmax.f32 %v394_v61, 0.0  ;;  %v397_v12 = vadd.f32 %v848_v3, %v361_v62  ;;  %v398_v13 = vadd.f32 %v848_v3, %v362_v63  ;;  %v467_v62 = vld [vmem:[%s857_s30 + $0xd0] sm:$0xff]  ;;  %v468_v63 = vld [vmem:[%s857_s30 + $0xd8] sm:$0xff] }
  0x2a   : > { %520 = vst [vmem:[%s883_s7 + $0x78] sm:$0xff] %v488_v49  ;;  %v427_v14 = vmax.f32 %v395_v4, 0.0  ;;  %v428_v15 = vmax.f32 %v396_v5, 0.0  ;;  %v399_v18 = vadd.f32 %v848_v3, %v363_v6  ;;  %v400_v19 = vadd.f32 %v848_v3, %v364_v7  ;;  %v469_v6 = vld [vmem:[%s857_s30 + $0xe0] sm:$0xff] }
  0x2b   : > { %v489_v21 = vadd.f32 %v457_v1, %v425_v8  ;;  %v490_v22 = vadd.f32 %v458_v2, %v426_v9  ;;  %v429_v23 = vmax.f32 %v397_v12, 0.0  ;;  %v430_v24 = vmax.f32 %v398_v13, 0.0  ;;  %v470_v12 = vld [vmem:[%s857_s30 + $0xe8] sm:$0xff] }
  0x2c   : > { %v491_v28 = vadd.f32 %v459_v10, %v427_v14  ;;  %v492_v29 = vadd.f32 %v460_v11, %v428_v15  ;;  %v431_v30 = vmax.f32 %v399_v18, 0.0  ;;  %v432_v31 = vmax.f32 %v400_v19, 0.0  ;;  %v472_v19 = vld [vmem:[%s857_s30 + $0xf8] sm:$0xff] }
  0x2d   : > { %521 = vst [vmem:[%s883_s7 + $0x80] sm:$0xff] %v489_v21  ;;  %v493_v33 = vadd.f32 %v461_v16, %v429_v23  ;;  %v494_v34 = vadd.f32 %v462_v17, %v430_v24  ;;  %v708_v35 = vunpack.c.l.bf16 %v733_v20  ;;  %v709_v36 = vunpack.c.h.bf16 %v733_v20  ;;  %v471_v16 = vld [vmem:[%s857_s30 + $0xf0] sm:$0xff] }
  0x2e   : > { %522 = vst [vmem:[%s883_s7 + $0x88] sm:$0xff] %v490_v22  ;;  %v495_v38 = vadd.f32 %v463_v25, %v431_v30  ;;  %v496_v39 = vadd.f32 %v464_v26, %v432_v31  ;;  %v712_v40 = vunpack.c.l.bf16 %v734_v27  ;;  %v713_v41 = vunpack.c.h.bf16 %v734_v27 }
  0x2f   : > { %523 = vst [vmem:[%s883_s7 + $0x90] sm:$0xff] %v491_v28  ;;  %v365_v42 = vmul.f32 %v841_v0, %v708_v35  ;;  %v366_v43 = vmul.f32 %v841_v0, %v709_v36  ;;  %v716_v44 = vunpack.c.l.bf16 %v735_v32  ;;  %v717_v45 = vunpack.c.h.bf16 %v735_v32 }
  0x30   : > { %524 = vst [vmem:[%s883_s7 + $0x98] sm:$0xff] %v492_v29  ;;  %v367_v46 = vmul.f32 %v841_v0, %v712_v40  ;;  %v368_v47 = vmul.f32 %v841_v0, %v713_v41  ;;  %v720_v48 = vunpack.c.l.bf16 %v736_v37  ;;  %v721_v49 = vunpack.c.h.bf16 %v736_v37 }
  0x31   : > { %525 = vst [vmem:[%s883_s7 + $0xa0] sm:$0xff] %v493_v33  ;;  %v401_v50 = vadd.f32 %v848_v3, %v365_v42  ;;  %v402_v51 = vadd.f32 %v848_v3, %v366_v43  ;;  %v369_v52 = vmul.f32 %v841_v0, %v716_v44  ;;  %v370_v53 = vmul.f32 %v841_v0, %v717_v45 }
  0x32   : > { %526 = vst [vmem:[%s883_s7 + $0xa8] sm:$0xff] %v494_v34  ;;  %v403_v56 = vadd.f32 %v848_v3, %v367_v46  ;;  %v404_v57 = vadd.f32 %v848_v3, %v368_v47  ;;  %v371_v58 = vmul.f32 %v841_v0, %v720_v48  ;;  %v372_v59 = vmul.f32 %v841_v0, %v721_v49 }
  0x33   : > { %527 = vst [vmem:[%s883_s7 + $0xb0] sm:$0xff] %v495_v38  ;;  %v433_v60 = vmax.f32 %v401_v50, 0.0  ;;  %v434_v61 = vmax.f32 %v402_v51, 0.0  ;;  %v405_v1 = vadd.f32 %v848_v3, %v369_v52  ;;  %v406_v2 = vadd.f32 %v848_v3, %v370_v53 }
  0x34   : > { %528 = vst [vmem:[%s883_s7 + $0xb8] sm:$0xff] %v496_v39  ;;  %v435_v4 = vmax.f32 %v403_v56, 0.0  ;;  %v436_v5 = vmax.f32 %v404_v57, 0.0  ;;  %v407_v0 = vadd.f32 %v848_v3, %v371_v58  ;;  %v408_v7 = vadd.f32 %v848_v3, %v372_v59 }
  0x35   : > { %v497_v8 = vadd.f32 %v465_v54, %v433_v60  ;;  %v498_v9 = vadd.f32 %v466_v55, %v434_v61  ;;  %v437_v10 = vmax.f32 %v405_v1, 0.0  ;;  %v438_v11 = vmax.f32 %v406_v2, 0.0 }
  0x36   : > { %v499_v13 = vadd.f32 %v467_v62, %v435_v4  ;;  %v500_v14 = vadd.f32 %v468_v63, %v436_v5  ;;  %v439_v15 = vmax.f32 %v407_v0, 0.0  ;;  %v440_v17 = vmax.f32 %v408_v7, 0.0 }
  0x37   : > { %529 = vst [vmem:[%s883_s7 + $0xc0] sm:$0xff] %v497_v8  ;;  %v501_v18 = vadd.f32 %v469_v6, %v437_v10  ;;  %v502_v3 = vadd.f32 %v470_v12, %v438_v11 }
  0x38   : > { %530 = vst [vmem:[%s883_s7 + $0xc8] sm:$0xff] %v498_v9  ;;  %v503_v20 = vadd.f32 %v471_v16, %v439_v15  ;;  %v504_v21 = vadd.f32 %v472_v19, %v440_v17 }
  0x39   : > { %531 = vst [vmem:[%s883_s7 + $0xd0] sm:$0xff] %v499_v13 }
  0x3a   : > { %532 = vst [vmem:[%s883_s7 + $0xd8] sm:$0xff] %v500_v14 }
  0x3b   : > { %533 = vst [vmem:[%s883_s7 + $0xe0] sm:$0xff] %v501_v18 }
  0x3c   : > { %534 = vst [vmem:[%s883_s7 + $0xe8] sm:$0xff] %v502_v3 }
  0x3d   : > { %535 = vst [vmem:[%s883_s7 + $0xf0] sm:$0xff] %v503_v20 }
  0x3e   : > { %536 = vst [vmem:[%s883_s7 + $0xf8] sm:$0xff] %v504_v21 }
  0x3f PF: > { %s14_s17 = sadd.s32 1, %s785_s17   ;;  %s1021_s15 = smov %s781_s16 }
  0x40   : > { %p11_p5 = scmp.ge.s32.totalorder %s14_s17, 4   ;;  %s1022_s16 = smov %s1024_s18 }
  0x42   :  { %13 = sbr.rel (!%p11_p5) target bundleno = 2 (0x2), region = 69 }

// kernel: resblock_forward.2
= control target key start
LH: loop header
LB: loop body
LE: loop exit
PB: predicated region body
PF: predicated region fallthrough
CT: control target
= control target key end

     0   :  { %s3102_s12 = smov 0   ;;  %s3869_s0 = inlined_call_operand.vmem [shape: f32[2,18,18,128], index: 0, kind: input, shape index: {}]   ;;  %s3870_s1 = inlined_call_operand.vmem [shape: bf16[3,384,128], index: 1, kind: input, shape index: {}]   ;;  %s3871_s2 = inlined_call_operand.vmem [shape: bf16[2,256,128], index: 2, kind: output, shape index: {0}]   ;;  %s3872_s3 = inlined_call_operand.vmem [shape: f32[2,2,128], index: 3, kind: output, shape index: {1}]  }
   0x1 LB: > { %s2286_s13 = sadd.s32 4294967295, %s3080_s12   ;;  %p2290_p0 = scmp.ge.s32.totalorder %s3080_s12, 1  ;;  %s3080_s12 = sphi %s3102_s12, %s14_s12  }
   0x2   : > { %p140_p1 = scmp.lt.s32.totalorder %s3080_s12, 3 }
   0x4   : > { %p141_p2 = pnand %p2290_p0, %p140_p1 }
   0x5   : > { %p168_p3 = scmp.lt.s32.totalorder (!%p141_p2), %s2286_s13, 1 }
   0x6   : > { %144 = sbr.rel (%p141_p2) target bundleno = 768 (0x300), region = 28 }
   0xb   : > { %v2905_v0 = vld [vmem:[%s3870_s1 + $0xf8] sm:$0xff]  ;;  %v2904_v1 = vld [vmem:[%s3870_s1 + $0xf0] sm:$0xff]  ;;  %v2903_v2 = vld [vmem:[%s3870_s1 + $0xe8] sm:$0xff]  ;;  %s3874_s13 = smov (!%p168_p3, %s2286_s13), 1  ;;  %vm2197_vm0 = vcmask 1040384  }
   0xc   : > { %712 = vmatpush.bf16.msra.mxu0 %v2905_v0  ;;  %3041 = vmatpush.bf16.msra.mxu1 %v2905_v0  ;;  %v2902_v3 = vld [vmem:[%s3870_s1 + $0xe0] sm:$0xff]  ;;  %v2901_v4 = vld [vmem:[%s3870_s1 + $0xd8] sm:$0xff]  ;;  %v2900_v5 = vld [vmem:[%s3870_s1 + $0xd0] sm:$0xff]  ;;  %s3065_s26 = smul.u32 432, %s3874_s13  ;;  %s2873_s17 = sshll.u32 %s3874_s13, 7 }
   0xd   : > { %3042 = vmatpush.bf16.msra.mxu2 %v2905_v0  ;;  %3043 = vmatpush.bf16.msra.mxu3 %v2905_v0  ;;  %v2899_v6 = vld [vmem:[%s3870_s1 + $0xc8] sm:$0xff]  ;;  %v2898_v7 = vld [vmem:[%s3870_s1 + $0xc0] sm:$0xff]  ;;  %v2921_v16 = vld [vmem:[%s3870_s1 + $0x178] sm:$0xff]  ;;  %s3762_s20 = scalar_lea.vmem %s3871_s2, %s2873_s17 }
   0xe   : > { %s3137_s4 = scalar_lea.vmem %s3869_s0, %s3065_s26  ;;  %v2881_v17 = vld [vmem:[%s3870_s1 + $0x38] sm:$0xff]  ;;  %v2920_v24 = vld [vmem:[%s3870_s1 + $0x170] sm:$0xff]  ;;  %v2919_v28 = vld [vmem:[%s3870_s1 + $0x168] sm:$0xff] }
   0xf   : > { %v2295_v8 = vld [vmem:[%s3137_s4 + $0x18] sm:$0xff]  ;;  %v2296_v9 = vld [vmem:[%s3137_s4 + $0x20] sm:$0xff]  ;;  %v2880_v25 = vld [vmem:[%s3870_s1 + $0x30] sm:$0xff] }
  0x10   : > { %713 = vmatpush.bf16.msra.mxu0 %v2904_v1  ;;  %3044 = vmatpush.bf16.msra.mxu1 %v2904_v1  ;;  %v2303_v10 = vld [vmem:[%s3137_s4 + $0x78] sm:$0xff]  ;;  %v2304_v11 = vld [vmem:[%s3137_s4 + $0x80] sm:$0xff]  ;;  %v3156_v18 = vpack.c.bf16 %v2296_v9, %v2295_v8  ;;  %v2912_v26 = vld [vmem:[%s3870_s1 + $0x130] sm:$0xff] }
  0x11   : > { %3045 = vmatpush.bf16.msra.mxu2 %v2904_v1  ;;  %3046 = vmatpush.bf16.msra.mxu3 %v2904_v1  ;;  %v2311_v12 = vld [vmem:[%s3137_s4 + $0xd8] sm:$0xff]  ;;  %v2312_v13 = vld [vmem:[%s3137_s4 + $0xe0] sm:$0xff]  ;;  %v3158_v19 = vpack.c.bf16 %v2304_v11, %v2303_v10  ;;  %v2888_v27 = vld [vmem:[%s3870_s1 + $0x70] sm:$0xff] }
  0x12   : > { %v2319_v14 = vld [vmem:[%s3137_s4 + $0x138] sm:$0xff]  ;;  %v2320_v15 = vld [vmem:[%s3137_s4 + $0x140] sm:$0xff]  ;;  %v3160_v20 = vpack.c.bf16 %v2312_v13, %v2311_v12  ;;  %v2879_v29 = vld [vmem:[%s3870_s1 + $0x28] sm:$0xff] }
  0x13   : > { %v507_v21 = vpack.c.bf16 %v2320_v15, %v2319_v14  ;;  %v2913_v22 = vld [vmem:[%s3870_s1 + $0x138] sm:$0xff]  ;;  %v2911_v30 = vld [vmem:[%s3870_s1 + $0x128] sm:$0xff]  ;;  %v2297_v32 = vld [vmem:[%s3137_s4 + $0x30] sm:$0xff] }
  0x14   : > { %714 = vmatpush.bf16.msra.mxu0 %v2903_v2  ;;  %3047 = vmatpush.bf16.msra.mxu1 %v2903_v2  ;;  %v2889_v23 = vld [vmem:[%s3870_s1 + $0x78] sm:$0xff]  ;;  %v2887_v31 = vld [vmem:[%s3870_s1 + $0x68] sm:$0xff]  ;;  %v2918_v33 = vld [vmem:[%s3870_s1 + $0x160] sm:$0xff] }
  0x15   : > { %3048 = vmatpush.bf16.msra.mxu2 %v2903_v2  ;;  %3049 = vmatpush.bf16.msra.mxu3 %v2903_v2  ;;  %v2878_v34 = vld [vmem:[%s3870_s1 + $0x20] sm:$0xff]  ;;  %v2298_v35 = vld [vmem:[%s3137_s4 + $0x38] sm:$0xff]  ;;  %v2305_v36 = vld [vmem:[%s3137_s4 + $0x90] sm:$0xff] }
  0x16   : > { %v2306_v37 = vld [vmem:[%s3137_s4 + $0x98] sm:$0xff]  ;;  %v2313_v38 = vld [vmem:[%s3137_s4 + $0xf0] sm:$0xff]  ;;  %v2910_v42 = vld [vmem:[%s3870_s1 + $0x120] sm:$0xff]  ;;  %v3221_v46 = vpack.c.bf16 %v2298_v35, %v2297_v32 }
  0x17   : > { %v2314_v39 = vld [vmem:[%s3137_s4 + $0xf8] sm:$0xff]  ;;  %v2321_v40 = vld [vmem:[%s3137_s4 + $0x150] sm:$0xff]  ;;  %v2886_v43 = vld [vmem:[%s3870_s1 + $0x60] sm:$0xff]  ;;  %v3223_v47 = vpack.c.bf16 %v2306_v37, %v2305_v36 }
  0x18   : > { %715 = vmatpush.bf16.msra.mxu0 %v2902_v3  ;;  %3050 = vmatpush.bf16.msra.mxu1 %v2902_v3  ;;  %v2322_v41 = vld [vmem:[%s3137_s4 + $0x158] sm:$0xff]  ;;  %v3225_v48 = vpack.c.bf16 %v2314_v39, %v2313_v38  ;;  %v2916_v52 = vld [vmem:[%s3870_s1 + $0x150] sm:$0xff]  ;;  %v2915_v56 = vld [vmem:[%s3870_s1 + $0x148] sm:$0xff] }
  0x19   : > { %3051 = vmatpush.bf16.msra.mxu2 %v2902_v3  ;;  %3052 = vmatpush.bf16.msra.mxu3 %v2902_v3  ;;  %v2917_v44 = vld [vmem:[%s3870_s1 + $0x158] sm:$0xff]  ;;  %v510_v49 = vpack.c.bf16 %v2322_v41, %v2321_v40  ;;  %v2876_v53 = vld [vmem:[%s3870_s1 + $0x10] sm:$0xff]  ;;  %v2875_v57 = vld [vmem:[%s3870_s1 + $0x8] sm:$0xff] }
  0x1a   : > { %v2877_v45 = vld [vmem:[%s3870_s1 + $0x18] sm:$0xff]  ;;  %v2908_v54 = vld [vmem:[%s3870_s1 + $0x110] sm:$0xff]  ;;  %v2907_v58 = vld [vmem:[%s3870_s1 + $0x108] sm:$0xff] }
  0x1b   : > { %v2909_v50 = vld [vmem:[%s3870_s1 + $0x118] sm:$0xff]  ;;  %v2884_v55 = vld [vmem:[%s3870_s1 + $0x50] sm:$0xff]  ;;  %v2883_v59 = vld [vmem:[%s3870_s1 + $0x48] sm:$0xff] }
  0x1c   : > { %716 = vmatpush.bf16.msra.mxu0 %v2901_v4  ;;  %3053 = vmatpush.bf16.msra.mxu1 %v2901_v4  ;;  %v2885_v51 = vld [vmem:[%s3870_s1 + $0x58] sm:$0xff]  ;;  %v2299_v60 = vld [vmem:[%s3137_s4 + $0x48] sm:$0xff]  ;;  %v2914_v61 = vld [vmem:[%s3870_s1 + $0x140] sm:$0xff] }
  0x1d   : > { %3054 = vmatpush.bf16.msra.mxu2 %v2901_v4  ;;  %3055 = vmatpush.bf16.msra.mxu3 %v2901_v4  ;;  %v2874_v62 = vld [vmem:[%s3870_s1] sm:$0xff]  ;;  %v2300_v63 = vld [vmem:[%s3137_s4 + $0x50] sm:$0xff]  ;;  %v2307_v0 = vld [vmem:[%s3137_s4 + $0xa8] sm:$0xff] }
  0x1e   : > { %v2308_v1 = vld [vmem:[%s3137_s4 + $0xb0] sm:$0xff]  ;;  %v2315_v2 = vld [vmem:[%s3137_s4 + $0x108] sm:$0xff]  ;;  %v3280_v8 = vpack.c.bf16 %v2300_v63, %v2299_v60  ;;  %v2929_v12 = vld [vmem:[%s3870_s1 + $0x1b8] sm:$0xff] }
  0x1f   : > { %v2316_v3 = vld [vmem:[%s3137_s4 + $0x110] sm:$0xff]  ;;  %v2323_v4 = vld [vmem:[%s3137_s4 + $0x168] sm:$0xff]  ;;  %v3282_v9 = vpack.c.bf16 %v2308_v1, %v2307_v0  ;;  %v2937_v13 = vld [vmem:[%s3870_s1 + $0x1f8] sm:$0xff] }
  0x20   : > { %717 = vmatpush.bf16.msra.mxu0 %v2900_v5  ;;  %3056 = vmatpush.bf16.msra.mxu1 %v2900_v5  ;;  %v3284_v10 = vpack.c.bf16 %v2316_v3, %v2315_v2  ;;  %v2897_v14 = vld [vmem:[%s3870_s1 + $0xb8] sm:$0xff]  ;;  %v2328_v32 = vld [vmem:[%s3137_s4 + $0x21] sm:$0xff]  ;;  %v215_v35 = vld [vmem:[%s3137_s4 + $0x9] sm:$0xff] }
  0x21   : > { %3057 = vmatpush.bf16.msra.mxu2 %v2900_v5  ;;  %3058 = vmatpush.bf16.msra.mxu3 %v2900_v5  ;;  %v2324_v5 = vld [vmem:[%s3137_s4 + $0x170] sm:$0xff]  ;;  %v2945_v15 = vld [vmem:[%s3870_s1 + $0x238] sm:$0xff]  ;;  %v2360_v36 = vld [vmem:[%s3137_s4 + $0x22] sm:$0xff] }
  0x22   : > { %v513_v11 = vpack.c.bf16 %v2324_v5, %v2323_v4  ;;  %v182_v37 = vld [vmem:[%s3137_s4] sm:$0xff]  ;;  %v183_v38 = vld [vmem:[%s3137_s4 + $0x8] sm:$0xff] }
  0x23   : > { %v2895_v63 = vld [vmem:[%s3870_s1 + $0xa8] sm:$0xff] }
  0x24   : > { %718 = vmatpush.bf16.msra.mxu0 %v2899_v6  ;;  %3059 = vmatpush.bf16.msra.mxu1 %v2899_v6  ;;  %v2333_v0 = vld [vmem:[%s3137_s4 + $0x61] sm:$0xff]  ;;  %v2334_v1 = vld [vmem:[%s3137_s4 + $0x69] sm:$0xff] }
  0x25   : > { %3060 = vmatpush.bf16.msra.mxu2 %v2899_v6  ;;  %3061 = vmatpush.bf16.msra.mxu3 %v2899_v6  ;;  %v2906_v6 = vld [vmem:[%s3870_s1 + $0x100] sm:$0xff]  ;;  %v2366_v3 = vld [vmem:[%s3137_s4 + $0x6a] sm:$0xff]  ;;  %v481_v4 = vpack.c.bf16 %v2334_v1, %v2333_v0 }
  0x26   : > { %v2365_v2 = vld [vmem:[%s3137_s4 + $0x62] sm:$0xff]  ;;  %v2374_v1 = vld [vmem:[%s3137_s4 + $0xca] sm:$0xff] }
  0x27   : > { %v482_v5 = vpack.c.bf16 %v2366_v3, %v2365_v2  ;;  %v2373_v0 = vld [vmem:[%s3137_s4 + $0xc2] sm:$0xff] }
  0x28   : > { %719 = vmatpush.bf16.msra.mxu0 %v2898_v7  ;;  %3062 = vmatpush.bf16.msra.mxu1 %v2898_v7 }
  0x29   : > { %3063 = vmatpush.bf16.msra.mxu2 %v2898_v7  ;;  %3064 = vmatpush.bf16.msra.mxu3 %v2898_v7  ;;  %v2882_v7 = vld [vmem:[%s3870_s1 + $0x40] sm:$0xff] }
  0x2b   : > { %720 = vmatmul.bf16.vlgmr.msra.gmra.mxu0 %v3156_v18  ;;  %740 = vmatmul.bf16.vlgmr.msra.gmra.mxu1 %v3158_v19 }
  0x2c   : > { %760 = vmatmul.bf16.vlgmr.msra.gmra.mxu2 %v3160_v20  ;;  %780 = vmatmul.bf16.vlgmr.msra.gmra.mxu3 %v507_v21  ;;  %v2309_v21 = vld [vmem:[%s3137_s4 + $0xc0] sm:$0xff] }
  0x2d   : > { %890 = vmatpush.bf16.msrb.mxu2 %v2921_v16  ;;  %1123 = vmatpush.bf16.msrb.mxu3 %v2881_v17  ;;  %v2301_v16 = vld [vmem:[%s3137_s4 + $0x60] sm:$0xff]  ;;  %v2302_v17 = vld [vmem:[%s3137_s4 + $0x68] sm:$0xff] }
  0x2e   : > { %801 = vmatpush.bf16.msrb.mxu1 %v2913_v22  ;;  %1212 = vmatpush.bf16.msrb.mxu0 %v2889_v23  ;;  %v2310_v22 = vld [vmem:[%s3137_s4 + $0xc8] sm:$0xff]  ;;  %v2317_v23 = vld [vmem:[%s3137_s4 + $0x120] sm:$0xff] }
  0x31   : > { %891 = vmatpush.bf16.msrb.mxu2 %v2920_v24  ;;  %1124 = vmatpush.bf16.msrb.mxu3 %v2880_v25  ;;  %v2318_v24 = vld [vmem:[%s3137_s4 + $0x128] sm:$0xff]  ;;  %v2325_v25 = vld [vmem:[%s3137_s4 + $0x180] sm:$0xff] }
  0x32   : > { %802 = vmatpush.bf16.msrb.mxu1 %v2912_v26  ;;  %1213 = vmatpush.bf16.msrb.mxu0 %v2888_v27  ;;  %v2326_v26 = vld [vmem:[%s3137_s4 + $0x188] sm:$0xff]  ;;  %v3309_v27 = vpack.c.bf16 %v2302_v17, %v2301_v16  ;;  %v2934_v17 = vld [vmem:[%s3870_s1 + $0x1e0] sm:$0xff] }
  0x35   : > { %892 = vmatpush.bf16.msrb.mxu2 %v2919_v28  ;;  %1125 = vmatpush.bf16.msrb.mxu3 %v2879_v29  ;;  %v3311_v28 = vpack.c.bf16 %v2310_v22, %v2309_v21  ;;  %v3313_v29 = vpack.c.bf16 %v2318_v24, %v2317_v23 }
  0x36   : > { %803 = vmatpush.bf16.msrb.mxu1 %v2911_v30  ;;  %1214 = vmatpush.bf16.msrb.mxu0 %v2887_v31  ;;  %v516_v30 = vpack.c.bf16 %v2326_v26, %v2325_v25  ;;  %v2327_v31 = vld [vmem:[%s3137_s4 + $0x19] sm:$0xff] }
  0x37   : > { %v472_v39 = vpack.c.bf16 %v2328_v32, %v2327_v31  ;;  %v2894_v25 = vld [vmem:[%s3870_s1 + $0xa0] sm:$0xff]  ;;  %v2369_v31 = vld [vmem:[%s3137_s4 + $0x92] sm:$0xff] }
  0x38   : > { %v2942_v26 = vld [vmem:[%s3870_s1 + $0x220] sm:$0xff] }
  0x39   : > { %893 = vmatpush.bf16.msrb.mxu2 %v2918_v33  ;;  %1126 = vmatpush.bf16.msrb.mxu3 %v2878_v34  ;;  %v2359_v33 = vld [vmem:[%s3137_s4 + $0x1a] sm:$0xff] }
  0x3a   : > { %804 = vmatpush.bf16.msrb.mxu1 %v2910_v42  ;;  %1215 = vmatpush.bf16.msrb.mxu0 %v2886_v43  ;;  %v214_v34 = vld [vmem:[%s3137_s4 + $0x1] sm:$0xff]  ;;  %v473_v41 = vpack.c.bf16 %v2360_v36, %v2359_v33  ;;  %v278_v42 = vpack.c.bf16 %v183_v38, %v182_v37  ;;  %v2928_v43 = vld [vmem:[%s3870_s1 + $0x1b0] sm:$0xff] }
  0x3b   : > { %725 = vmatmul.bf16.gmra.mxu0 %v3221_v46  ;;  %745 = vmatmul.bf16.gmra.mxu1 %v3223_v47  ;;  %v279_v40 = vpack.c.bf16 %v215_v35, %v214_v34  ;;  %v2370_v32 = vld [vmem:[%s3137_s4 + $0x9a] sm:$0xff] }
  0x3c   : > { %765 = vmatmul.bf16.gmra.mxu2 %v3225_v48  ;;  %785 = vmatmul.bf16.gmra.mxu3 %v510_v49  ;;  %v2944_v49 = vld [vmem:[%s3870_s1 + $0x230] sm:$0xff]  ;;  %v488_v38 = vpack.c.bf16 %v2370_v32, %v2369_v31 }
  0x3d   : > { %894 = vmatpush.bf16.msrb.mxu2 %v2917_v44  ;;  %1127 = vmatpush.bf16.msrb.mxu3 %v2877_v45  ;;  %v2936_v44 = vld [vmem:[%s3870_s1 + $0x1f0] sm:$0xff] }
  0x3e   : > { %805 = vmatpush.bf16.msrb.mxu1 %v2909_v50  ;;  %1216 = vmatpush.bf16.msrb.mxu0 %v2885_v51  ;;  %v2896_v45 = vld [vmem:[%s3870_s1 + $0xb0] sm:$0xff]  ;;  %v2330_v51 = vld [vmem:[%s3137_s4 + $0x39] sm:$0xff] }
  0x3f   : > { %v2329_v50 = vld [vmem:[%s3137_s4 + $0x31] sm:$0xff] }
  0x41   : > { %895 = vmatpush.bf16.msrb.mxu2 %v2916_v52  ;;  %1128 = vmatpush.bf16.msrb.mxu3 %v2876_v53  ;;  %v2361_v52 = vld [vmem:[%s3137_s4 + $0x32] sm:$0xff]  ;;  %v2362_v53 = vld [vmem:[%s3137_s4 + $0x3a] sm:$0xff] }
  0x42   : > { %806 = vmatpush.bf16.msrb.mxu1 %v2908_v54  ;;  %1217 = vmatpush.bf16.msrb.mxu0 %v2884_v55  ;;  %v3342_v54 = vpack.c.bf16 %v2330_v51, %v2329_v50  ;;  %v3344_v55 = vpack.c.bf16 %v2362_v53, %v2361_v52 }
  0x45   : > { %896 = vmatpush.bf16.msrb.mxu2 %v2915_v56  ;;  %1129 = vmatpush.bf16.msrb.mxu3 %v2875_v57  ;;  %v2331_v56 = vld [vmem:[%s3137_s4 + $0x49] sm:$0xff]  ;;  %v2332_v57 = vld [vmem:[%s3137_s4 + $0x51] sm:$0xff] }
  0x46   : > { %807 = vmatpush.bf16.msrb.mxu1 %v2907_v58  ;;  %1218 = vmatpush.bf16.msrb.mxu0 %v2883_v59  ;;  %v2363_v58 = vld [vmem:[%s3137_s4 + $0x4a] sm:$0xff]  ;;  %v2364_v59 = vld [vmem:[%s3137_s4 + $0x52] sm:$0xff]  ;;  %v478_v60 = vpack.c.bf16 %v2332_v57, %v2331_v56 }
  0x47   : > { %v2925_v57 = vld [vmem:[%s3870_s1 + $0x198] sm:$0xff] }
  0x49   : > { %897 = vmatpush.bf16.msrb.mxu2 %v2914_v61  ;;  %1130 = vmatpush.bf16.msrb.mxu3 %v2874_v62  ;;  %v479_v61 = vpack.c.bf16 %v2364_v59, %v2363_v58  ;;  %v2935_v62 = vld [vmem:[%s3870_s1 + $0x1e8] sm:$0xff]  ;;  %v2933_v58 = vld [vmem:[%s3870_s1 + $0x1d8] sm:$0xff] }
  0x4a   : > { %808 = vmatpush.bf16.msrb.mxu1 %v2906_v6  ;;  %1219 = vmatpush.bf16.msrb.mxu0 %v2882_v7  ;;  %v2335_v6 = vld [vmem:[%s3137_s4 + $0x79] sm:$0xff]  ;;  %v2336_v7 = vld [vmem:[%s3137_s4 + $0x81] sm:$0xff] }
  0x4b   : > { %730 = vmatmul.bf16.gmra.mxu0 %v3280_v8  ;;  %750 = vmatmul.bf16.gmra.mxu1 %v3282_v9 }
  0x4c   : > { %770 = vmatmul.bf16.gmra.mxu2 %v3284_v10  ;;  %790 = vmatmul.bf16.gmra.mxu3 %v513_v11  ;;  %v2367_v11 = vld [vmem:[%s3137_s4 + $0x7a] sm:$0xff] }
  0x4d   : > { %1728 = vmatpush.bf16.msra.mxu2 %v2929_v12  ;;  %1817 = vmatpush.bf16.msra.mxu3 %v2937_v13  ;;  %v2368_v12 = vld [vmem:[%s3137_s4 + $0x82] sm:$0xff]  ;;  %v484_v13 = vpack.c.bf16 %v2336_v7, %v2335_v6  ;;  %v494_v7 = vpack.c.bf16 %v2374_v1, %v2373_v0  ;;  %v2377_v0 = vld [vmem:[%s3137_s4 + $0xf2] sm:$0xff]  ;;  %v2378_v1 = vld [vmem:[%s3137_s4 + $0xfa] sm:$0xff] }
  0x4e   : > { %1301 = vmatpush.bf16.msra.mxu1 %v2897_v14  ;;  %1906 = vmatpush.bf16.msra.mxu0 %v2945_v15  ;;  %v485_v16 = vpack.c.bf16 %v2368_v12, %v2367_v11 }
  0x51   : > { %1729 = vmatpush.bf16.msra.mxu2 %v2928_v43  ;;  %1818 = vmatpush.bf16.msra.mxu3 %v2936_v44  ;;  %v2339_v43 = vld [vmem:[%s3137_s4 + $0xa9] sm:$0xff]  ;;  %v2340_v44 = vld [vmem:[%s3137_s4 + $0xb1] sm:$0xff] }
  0x52   : > { %1302 = vmatpush.bf16.msra.mxu1 %v2896_v45  ;;  %1907 = vmatpush.bf16.msra.mxu0 %v2944_v49  ;;  %v2371_v45 = vld [vmem:[%s3137_s4 + $0xaa] sm:$0xff]  ;;  %v2372_v49 = vld [vmem:[%s3137_s4 + $0xb2] sm:$0xff]  ;;  %v490_v52 = vpack.c.bf16 %v2340_v44, %v2339_v43 }
  0x53   : > { %v491_v56 = vpack.c.bf16 %v2372_v49, %v2371_v45  ;;  %v2924_v43 = vld [vmem:[%s3870_s1 + $0x190] sm:$0xff] }
  0x54   : > { %v2932_v44 = vld [vmem:[%s3870_s1 + $0x1d0] sm:$0xff] }
  0x55   : > { %1819 = vmatpush.bf16.msra.mxu3 %v2935_v62  ;;  %v2941_v62 = vld [vmem:[%s3870_s1 + $0x218] sm:$0xff] }
  0x56   : > { %1303 = vmatpush.bf16.msra.mxu1 %v2895_v63  ;;  %v2341_v63 = vld [vmem:[%s3137_s4 + $0xc1] sm:$0xff] }
  0x59   : > { %1820 = vmatpush.bf16.msra.mxu3 %v2934_v17  ;;  %v2344_v17 = vld [vmem:[%s3137_s4 + $0xe1] sm:$0xff] }
  0x5a   : > { %1304 = vmatpush.bf16.msra.mxu1 %v2894_v25  ;;  %v2375_v25 = vld [vmem:[%s3137_s4 + $0xda] sm:$0xff] }
  0x5b   : > { %735 = vmatmul.bf16.gmra.mxu0 %v3309_v27  ;;  %755 = vmatmul.bf16.gmra.mxu1 %v3311_v28 }
  0x5c   : > { %775 = vmatmul.bf16.gmra.mxu2 %v3313_v29  ;;  %795 = vmatmul.bf16.gmra.mxu3 %v516_v30  ;;  %v2338_v30 = vld [vmem:[%s3137_s4 + $0x99] sm:$0xff] }
  0x5d   : > { %1821 = vmatpush.bf16.msra.mxu3 %v2933_v58  ;;  %v2892_v58 = vld [vmem:[%s3870_s1 + $0x90] sm:$0xff] }
  0x61   : > { %1822 = vmatpush.bf16.msra.mxu3 %v2932_v44 }
  0x6b   : > { %809 = vmatmul.bf16.vlgmr.msrb.gmra.mxu1 %v472_v39  ;;  %1220 = vmatmul.bf16.vlgmr.msrb.gmra.mxu0 %v279_v40 }
  0x6c   : > { %898 = vmatmul.bf16.vlgmr.msrb.gmra.mxu2 %v473_v41  ;;  %1131 = vmatmul.bf16.vlgmr.msrb.gmra.mxu3 %v278_v42 }
  0x7b   : > { %814 = vmatmul.bf16.gmra.mxu1 %v3342_v54  ;;  %1225 = vmatmul.bf16.gmra.mxu0 %v472_v39 }
  0x7c   : > { %903 = vmatmul.bf16.gmra.mxu2 %v3344_v55  ;;  %1136 = vmatmul.bf16.gmra.mxu3 %v3156_v18  ;;  %v2927_v18 = vld [vmem:[%s3870_s1 + $0x1a8] sm:$0xff] }
  0x7d   : > { %1730 = vmatpush.bf16.msra.mxu2 %v2927_v18 }
  0x8b   : > { %819 = vmatmul.bf16.gmra.mxu1 %v478_v60  ;;  %1230 = vmatmul.bf16.gmra.mxu0 %v3342_v54 }
  0x8c   : > { %908 = vmatmul.bf16.gmra.mxu2 %v479_v61  ;;  %1141 = vmatmul.bf16.gmra.mxu3 %v3221_v46  ;;  %v2943_v46 = vld [vmem:[%s3870_s1 + $0x228] sm:$0xff] }
  0x8d   : > { %1908 = vmatpush.bf16.msra.mxu0 %v2943_v46  ;;  %v2342_v46 = vld [vmem:[%s3137_s4 + $0xc9] sm:$0xff] }
  0x91   : > { %1909 = vmatpush.bf16.msra.mxu0 %v2942_v26  ;;  %v2376_v26 = vld [vmem:[%s3137_s4 + $0xe2] sm:$0xff] }
  0x95   : > { %1910 = vmatpush.bf16.msra.mxu0 %v2941_v62  ;;  %v2345_v62 = vld [vmem:[%s3137_s4 + $0xf1] sm:$0xff] }
  0x9b   : > { %824 = vmatmul.bf16.gmra.mxu1 %v481_v4  ;;  %1235 = vmatmul.bf16.gmra.mxu0 %v478_v60 }
  0x9c   : > { %913 = vmatmul.bf16.gmra.mxu2 %v482_v5  ;;  %1146 = vmatmul.bf16.gmra.mxu3 %v3280_v8  ;;  %v2926_v8 = vld [vmem:[%s3870_s1 + $0x1a0] sm:$0xff] }
  0x9d   : > { %1731 = vmatpush.bf16.msra.mxu2 %v2926_v8  ;;  %v2343_v8 = vld [vmem:[%s3137_s4 + $0xd9] sm:$0xff] }
  0x9e   : > { %v496_v31 = vpack.c.bf16 %v2344_v17, %v2343_v8 }
  0xa1   : > { %1732 = vmatpush.bf16.msra.mxu2 %v2925_v57 }
  0xa5   : > { %1733 = vmatpush.bf16.msra.mxu2 %v2924_v43 }
  0xa8   : > { %v3376_v14 = vpop.f32.mrf.mxu0  ;;  %v3378_v15 = vpop.f32.mrf.mxu1 }
  0xab   : > { %829 = vmatmul.bf16.gmra.mxu1 %v484_v13  ;;  %1240 = vmatmul.bf16.gmra.mxu0 %v481_v4  ;;  %v493_v4 = vpack.c.bf16 %v2342_v46, %v2341_v63  ;;  %v2346_v63 = vld [vmem:[%s3137_s4 + $0xf9] sm:$0xff] }
  0xac   : > { %918 = vmatmul.bf16.gmra.mxu2 %v485_v16  ;;  %1151 = vmatmul.bf16.gmra.mxu3 %v3309_v27  ;;  %v2337_v27 = vld [vmem:[%s3137_s4 + $0x91] sm:$0xff] }
  0xad   : > { %v487_v35 = vpack.c.bf16 %v2338_v30, %v2337_v27 }
  0xaf   : > { %v3387_v21 = vpop.f32.mrf.mxu2  ;;  %v3389_v22 = vpop.f32.mrf.mxu3 }
  0xb0   : > { %v3391_v23 = vpop.f32.mrf.mxu0  ;;  %v3393_v24 = vpop.f32.mrf.mxu1 }
  0xb7   : > { %v3405_v33 = vpop.f32.mrf.mxu2  ;;  %v3407_v34 = vpop.f32.mrf.mxu3 }
  0xb8   : > { %v3409_v36 = vpop.f32.mrf.mxu0  ;;  %v3411_v37 = vpop.f32.mrf.mxu1 }
  0xbb   : > { %834 = vmatmul.bf16.gmra.mxu1 %v487_v35  ;;  %1245 = vmatmul.bf16.gmra.mxu0 %v484_v13 }
  0xbc   : > { %923 = vmatmul.bf16.gmra.mxu2 %v488_v38  ;;  %1156 = vmatmul.bf16.gmra.mxu3 %v3158_v19 }
  0xbf   : > { %v3414_v39 = vpop.f32.mrf.mxu2  ;;  %v3416_v40 = vpop.f32.mrf.mxu3 }
  0xc0   : > { %v3418_v41 = vpop.f32.mrf.mxu0  ;;  %v3420_v42 = vpop.f32.mrf.mxu1 }
  0xc7   : > { %v3426_v50 = vpop.f32.mrf.mxu2  ;;  %v3428_v51 = vpop.f32.mrf.mxu3 }
  0xc8   : > { %v3430_v53 = vpop.f32.mrf.mxu0  ;;  %v3432_v19 = vpop.f32.mrf.mxu1 }
  0xcb   : > { %839 = vmatmul.bf16.gmra.mxu1 %v490_v52  ;;  %1250 = vmatmul.bf16.gmra.mxu0 %v487_v35 }
  0xcc   : > { %928 = vmatmul.bf16.gmra.mxu2 %v491_v56  ;;  %1161 = vmatmul.bf16.gmra.mxu3 %v3223_v47  ;;  %v2893_v47 = vld [vmem:[%s3870_s1 + $0x98] sm:$0xff] }
  0xcd   : > { %1305 = vmatpush.bf16.msra.mxu1 %v2893_v47  ;;  %v2940_v47 = vld [vmem:[%s3870_s1 + $0x210] sm:$0xff] }
  0xce   : > { %1911 = vmatpush.bf16.msra.mxu0 %v2940_v47 }
  0xcf   : > { %v3441_v59 = vpop.f32.mrf.mxu2  ;;  %v3443_v60 = vpop.f32.mrf.mxu3 }
  0xd0   : > { %v3445_v61 = vpop.f32.mrf.mxu0  ;;  %v3447_v18 = vpop.f32.mrf.mxu1 }
  0xd1   : > { %1306 = vmatpush.bf16.msra.mxu1 %v2892_v58  ;;  %v2379_v58 = vld [vmem:[%s3137_s4 + $0x10a] sm:$0xff] }
  0xd7   : > { %v3459_v2 = vpop.f32.mrf.mxu2  ;;  %v3461_v3 = vpop.f32.mrf.mxu3 }
  0xd8   : > { %v3463_v5 = vpop.f32.mrf.mxu0  ;;  %v3465_v6 = vpop.f32.mrf.mxu1 }
  0xdb   : > { %844 = vmatmul.bf16.gmra.mxu1 %v493_v4  ;;  %1255 = vmatmul.bf16.gmra.mxu0 %v490_v52 }
  0xdc   : > { %933 = vmatmul.bf16.gmra.mxu2 %v494_v7  ;;  %1166 = vmatmul.bf16.gmra.mxu3 %v3282_v9  ;;  %v497_v9 = vpack.c.bf16 %v2376_v26, %v2375_v25  ;;  %v3507_v26 = vpack.c.bf16 %v2378_v1, %v2377_v0 }
  0xdf   : > { %v3468_v11 = vpop.f32.mrf.mxu2  ;;  %v3470_v12 = vpop.f32.mrf.mxu3 }
  0xe0   : > { %v3472_v13 = vpop.f32.mrf.mxu0  ;;  %v3474_v16 = vpop.f32.mrf.mxu1 }
  0xe7   : > { %v3480_v27 = vpop.f32.mrf.mxu2  ;;  %v3482_v30 = vpop.f32.mrf.mxu3 }
  0xe8   : > { %v810_v32 = vpop.f32.mrf.mxu1  ;;  %v1221_v35 = vpop.f32.mrf.mxu0 }
  0xe9   : > { %v811_v38 = vadd.f32 %v810_v32, %v3376_v14 }
  0xeb   : > { %849 = vmatmul.bf16.gmra.mxu1 %v496_v31  ;;  %1260 = vmatmul.bf16.gmra.mxu0 %v493_v4 }
  0xec   : > { %938 = vmatmul.bf16.gmra.mxu2 %v497_v9  ;;  %1171 = vmatmul.bf16.gmra.mxu3 %v3311_v28 }
  0xef   : > { %v899_v14 = vpop.f32.mrf.mxu2  ;;  %v1132_v45 = vpop.f32.mrf.mxu3 }
  0xf0   : > { %v900_v49 = vadd.f32 %v899_v14, %v811_v38  ;;  %v812_v52 = vpop.f32.mrf.mxu1  ;;  %v1223_v56 = vpop.f32.mrf.mxu0 }
  0xf1   : > { %v813_v57 = vadd.f32 %v812_v52, %v3391_v23  ;;  %v3505_v23 = vpack.c.bf16 %v2346_v63, %v2345_v62  ;;  %v2347_v52 = vld [vmem:[%s3137_s4 + $0x109] sm:$0xff] }
  0xf2   : > { %v1133_v28 = vadd.f32 %v1132_v45, %v900_v49 }
  0xf4   : > { %v3501_v46 = vadd.f32 %v1221_v35, %v1133_v28 }
  0xf7   : > { %v901_v4 = vpop.f32.mrf.mxu2  ;;  %v1134_v7 = vpop.f32.mrf.mxu3 }
  0xf8   : > { %v902_v8 = vadd.f32 %v901_v4, %v813_v57  ;;  %v815_v17 = vpop.f32.mrf.mxu1  ;;  %v1226_v25 = vpop.f32.mrf.mxu0  ;;  %v2348_v57 = vld [vmem:[%s3137_s4 + $0x111] sm:$0xff] }
  0xf9   : > { %v816_v32 = vadd.f32 %v815_v17, %v3409_v36  ;;  %v502_v63 = vpack.c.bf16 %v2348_v57, %v2347_v52  ;;  %v2381_v52 = vld [vmem:[%s3137_s4 + $0x122] sm:$0xff]  ;;  %v2382_v57 = vld [vmem:[%s3137_s4 + $0x12a] sm:$0xff] }
  0xfa   : > { %v1135_v9 = vadd.f32 %v1134_v7, %v902_v8  ;;  %v2931_v8 = vld [vmem:[%s3870_s1 + $0x1c8] sm:$0xff] }
  0xfb   : > { %854 = vmatmul.bf16.gmra.mxu1 %v3505_v23  ;;  %1265 = vmatmul.bf16.gmra.mxu0 %v496_v31  ;;  %v2380_v31 = vld [vmem:[%s3137_s4 + $0x112] sm:$0xff] }
  0xfc   : > { %943 = vmatmul.bf16.gmra.mxu2 %v3507_v26  ;;  %1176 = vmatmul.bf16.gmra.mxu3 %v3160_v20  ;;  %v3513_v35 = vadd.f32 %v1223_v56, %v1135_v9  ;;  %v503_v1 = vpack.c.bf16 %v2380_v31, %v2379_v58 }
  0xfd   : > { %1823 = vmatpush.bf16.msra.mxu3 %v2931_v8 }
  0xff   : > { %v904_v38 = vpop.f32.mrf.mxu2  ;;  %v1137_v43 = vpop.f32.mrf.mxu3 }
 0x100   : > { %v905_v44 = vadd.f32 %v904_v38, %v816_v32  ;;  %v817_v14 = vpop.f32.mrf.mxu1  ;;  %v1228_v45 = vpop.f32.mrf.mxu0 }
 0x101   : > { %v818_v49 = vadd.f32 %v817_v14, %v3418_v41  ;;  %v2923_v41 = vld [vmem:[%s3870_s1 + $0x188] sm:$0xff] }
 0x102   : > { %v1138_v36 = vadd.f32 %v1137_v43, %v905_v44  ;;  %1734 = vmatpush.bf16.msra.mxu2 %v2923_v41  ;;  %v2891_v44 = vld [vmem:[%s3870_s1 + $0x88] sm:$0xff] }
 0x103   : > { %v2939_v14 = vld [vmem:[%s3870_s1 + $0x208] sm:$0xff]  ;;  %1307 = vmatpush.bf16.msra.mxu1 %v2891_v44  ;;  %v2383_v44 = vld [vmem:[%s3137_s4 + $0x13a] sm:$0xff] }
 0x104   : > { %v3518_v28 = vadd.f32 %v1226_v25, %v1138_v36  ;;  %1912 = vmatpush.bf16.msra.mxu0 %v2939_v14  ;;  %v2384_v14 = vld [vmem:[%s3137_s4 + $0x142] sm:$0xff] }
 0x107   : > { %v906_v47 = vpop.f32.mrf.mxu2  ;;  %v1139_v62 = vpop.f32.mrf.mxu3 }
 0x108   : > { %v907_v20 = vadd.f32 %v906_v47, %v818_v49  ;;  %v820_v56 = vpop.f32.mrf.mxu1  ;;  %v1231_v0 = vpop.f32.mrf.mxu0  ;;  %v2350_v49 = vld [vmem:[%s3137_s4 + $0x129] sm:$0xff] }
 0x109   : > { %v821_v4 = vadd.f32 %v820_v56, %v3430_v53  ;;  %v506_v56 = vpack.c.bf16 %v2382_v57, %v2381_v52  ;;  %v509_v57 = vpack.c.bf16 %v2384_v14, %v2383_v44 }
 0x10a   : > { %v1140_v7 = vadd.f32 %v1139_v62, %v907_v20 }
 0x10b   : > { %859 = vmatmul.bf16.gmra.mxu1 %v502_v63  ;;  %1270 = vmatmul.bf16.gmra.mxu0 %v3505_v23 }
 0x10c   : > { %948 = vmatmul.bf16.gmra.mxu2 %v503_v1  ;;  %1181 = vmatmul.bf16.gmra.mxu3 %v3225_v48  ;;  %v3531_v17 = vadd.f32 %v1228_v45, %v1140_v7  ;;  %v2349_v45 = vld [vmem:[%s3137_s4 + $0x121] sm:$0xff] }
 0x10f   : > { %v909_v53 = vpop.f32.mrf.mxu2  ;;  %v1142_v25 = vpop.f32.mrf.mxu3 }
 0x110   : > { %v910_v32 = vadd.f32 %v909_v53, %v821_v4  ;;  %v822_v9 = vpop.f32.mrf.mxu1  ;;  %v1233_v48 = vpop.f32.mrf.mxu0 }
 0x111   : > { %v823_v38 = vadd.f32 %v822_v9, %v3445_v61  ;;  %v505_v61 = vpack.c.bf16 %v2350_v49, %v2349_v45 }
 0x112   : > { %v1143_v43 = vadd.f32 %v1142_v25, %v910_v32 }
 0x114   : > { %v3542_v36 = vadd.f32 %v1231_v0, %v1143_v43 }
 0x117   : > { %v911_v58 = vpop.f32.mrf.mxu2  ;;  %v1144_v31 = vpop.f32.mrf.mxu3 }
 0x118   : > { %v912_v47 = vadd.f32 %v911_v58, %v823_v38  ;;  %v825_v62 = vpop.f32.mrf.mxu1  ;;  %v1236_v20 = vpop.f32.mrf.mxu0  ;;  %v2351_v38 = vld [vmem:[%s3137_s4 + $0x139] sm:$0xff] }
 0x119   : > { %v826_v1 = vadd.f32 %v825_v62, %v3463_v5  ;;  %v2352_v5 = vld [vmem:[%s3137_s4 + $0x141] sm:$0xff] }
 0x11a   : > { %v1145_v4 = vadd.f32 %v1144_v31, %v912_v47  ;;  %v508_v49 = vpack.c.bf16 %v2352_v5, %v2351_v38  ;;  %v2930_v31 = vld [vmem:[%s3870_s1 + $0x1c0] sm:$0xff] }
 0x11b   : > { %864 = vmatmul.bf16.gmra.mxu1 %v505_v61  ;;  %1275 = vmatmul.bf16.gmra.mxu0 %v502_v63  ;;  %v209_v38 = vld [vmem:[%s3137_s4 + $0x140] sm:$0xff] }
 0x11c   : > { %953 = vmatmul.bf16.gmra.mxu2 %v506_v56  ;;  %1186 = vmatmul.bf16.gmra.mxu3 %v3284_v10  ;;  %v3548_v0 = vadd.f32 %v1233_v48, %v1145_v4 }
 0x11d   : > { %1824 = vmatpush.bf16.msra.mxu3 %v2930_v31 }
 0x11f   : > { %v914_v7 = vpop.f32.mrf.mxu2  ;;  %v1147_v41 = vpop.f32.mrf.mxu3 }
 0x120   : > { %v915_v8 = vadd.f32 %v914_v7, %v826_v1  ;;  %v827_v53 = vpop.f32.mrf.mxu1  ;;  %v1238_v25 = vpop.f32.mrf.mxu0  ;;  %v2890_v7 = vld [vmem:[%s3870_s1 + $0x80] sm:$0xff] }
 0x121   : > { %v828_v32 = vadd.f32 %v827_v53, %v3472_v13  ;;  %v2922_v13 = vld [vmem:[%s3870_s1 + $0x180] sm:$0xff]  ;;  %v2385_v53 = vld [vmem:[%s3137_s4 + $0x152] sm:$0xff]  ;;  %1308 = vmatpush.bf16.msra.mxu1 %v2890_v7 }
 0x122   : > { %v1148_v9 = vadd.f32 %v1147_v41, %v915_v8  ;;  %1735 = vmatpush.bf16.msra.mxu2 %v2922_v13  ;;  %v2938_v41 = vld [vmem:[%s3870_s1 + $0x200] sm:$0xff]  ;;  %v2356_v7 = vld [vmem:[%s3137_s4 + $0x171] sm:$0xff] }
 0x123   : > { %v2354_v8 = vld [vmem:[%s3137_s4 + $0x159] sm:$0xff]  ;;  %1913 = vmatpush.bf16.msra.mxu0 %v2938_v41  ;;  %v2387_v41 = vld [vmem:[%s3137_s4 + $0x16a] sm:$0xff] }
 0x124   : > { %v3553_v43 = vadd.f32 %v1236_v20, %v1148_v9  ;;  %v208_v9 = vld [vmem:[%s3137_s4 + $0x138] sm:$0xff] }
 0x127   : > { %v916_v63 = vpop.f32.mrf.mxu2  ;;  %v1149_v45 = vpop.f32.mrf.mxu3 }
 0x128   : > { %v917_v10 = vadd.f32 %v916_v63, %v828_v32  ;;  %v830_v48 = vpop.f32.mrf.mxu1  ;;  %v1241_v52 = vpop.f32.mrf.mxu0  ;;  %v2386_v32 = vld [vmem:[%s3137_s4 + $0x15a] sm:$0xff] }
 0x129   : > { %v831_v62 = vadd.f32 %v830_v48, %v3378_v15  ;;  %v2353_v15 = vld [vmem:[%s3137_s4 + $0x151] sm:$0xff] }
 0x12a   : > { %v1150_v58 = vadd.f32 %v1149_v45, %v917_v10  ;;  %v511_v63 = vpack.c.bf16 %v2354_v8, %v2353_v15  ;;  %v210_v8 = vld [vmem:[%s3137_s4 + $0x150] sm:$0xff] }
 0x12b   : > { %869 = vmatmul.bf16.gmra.mxu1 %v508_v49  ;;  %1280 = vmatmul.bf16.gmra.mxu0 %v505_v61 }
 0x12c   : > { %958 = vmatmul.bf16.gmra.mxu2 %v509_v57  ;;  %1191 = vmatmul.bf16.gmra.mxu3 %v3313_v29  ;;  %v3564_v47 = vadd.f32 %v1238_v25, %v1150_v58  ;;  %v512_v57 = vpack.c.bf16 %v2386_v32, %v2385_v53  ;;  %v3582_v58 = vpack.c.bf16 %v209_v38, %v208_v9  ;;  %v211_v53 = vld [vmem:[%s3137_s4 + $0x158] sm:$0xff] }
 0x12f   : > { %v919_v61 = vpop.f32.mrf.mxu2  ;;  %v1152_v29 = vpop.f32.mrf.mxu3 }
 0x130   : > { %v920_v20 = vadd.f32 %v919_v61, %v831_v62  ;;  %v832_v56 = vpop.f32.mrf.mxu1  ;;  %v1243_v1 = vpop.f32.mrf.mxu0 }
 0x131   : > { %v833_v5 = vadd.f32 %v832_v56, %v3393_v24 }
 0x132   : > { %v1153_v4 = vadd.f32 %v1152_v29, %v920_v20 }
 0x134   : > { %v3576_v25 = vadd.f32 %v1241_v52, %v1153_v4  ;;  %v2355_v4 = vld [vmem:[%s3137_s4 + $0x169] sm:$0xff] }
 0x135   : > { %v514_v38 = vpack.c.bf16 %v2356_v7, %v2355_v4  ;;  %v2389_v4 = vld [vmem:[%s3137_s4 + $0x182] sm:$0xff] }
 0x137   : > { %v921_v44 = vpop.f32.mrf.mxu2  ;;  %v1154_v14 = vpop.f32.mrf.mxu3 }
 0x138   : > { %v922_v45 = vadd.f32 %v921_v44, %v833_v5  ;;  %v835_v10 = vpop.f32.mrf.mxu1  ;;  %v1246_v48 = vpop.f32.mrf.mxu0 }
 0x139   : > { %v836_v52 = vadd.f32 %v835_v10, %v3411_v37 }
 0x13a   : > { %v1155_v13 = vadd.f32 %v1154_v14, %v922_v45  ;;  %v3597_v45 = vpack.c.bf16 %v211_v53, %v210_v8 }
 0x13b   : > { %874 = vmatmul.bf16.gmra.mxu1 %v511_v63  ;;  %1285 = vmatmul.bf16.gmra.mxu0 %v508_v49  ;;  %v2388_v49 = vld [vmem:[%s3137_s4 + $0x172] sm:$0xff] }
 0x13c   : > { %963 = vmatmul.bf16.gmra.mxu2 %v512_v57  ;;  %1196 = vmatmul.bf16.gmra.mxu3 %v3582_v58  ;;  %v3585_v24 = vadd.f32 %v1243_v1, %v1155_v13  ;;  %v515_v14 = vpack.c.bf16 %v2388_v49, %v2387_v41  ;;  %v212_v41 = vld [vmem:[%s3137_s4 + $0x168] sm:$0xff]  ;;  %v213_v49 = vld [vmem:[%s3137_s4 + $0x170] sm:$0xff] }
 0x13f   : > { %v924_v31 = vpop.f32.mrf.mxu2  ;;  %v1157_v62 = vpop.f32.mrf.mxu3 }
 0x140   : > { %v925_v61 = vadd.f32 %v924_v31, %v836_v52  ;;  %v837_v29 = vpop.f32.mrf.mxu1  ;;  %v1248_v20 = vpop.f32.mrf.mxu0 }
 0x141   : > { %v838_v32 = vadd.f32 %v837_v29, %v3420_v42  ;;  %v2357_v29 = vld [vmem:[%s3137_s4 + $0x181] sm:$0xff] }
 0x142   : > { %v1158_v56 = vadd.f32 %v1157_v62, %v925_v61 }
 0x144   : > { %v3591_v15 = vadd.f32 %v1246_v48, %v1158_v56  ;;  %v2358_v56 = vld [vmem:[%s3137_s4 + $0x189] sm:$0xff] }
 0x147   : > { %v926_v1 = vpop.f32.mrf.mxu2  ;;  %v1159_v9 = vpop.f32.mrf.mxu3 }
 0x148   : > { %v927_v37 = vadd.f32 %v926_v1, %v838_v32  ;;  %v840_v5 = vpop.f32.mrf.mxu1  ;;  %v1251_v44 = vpop.f32.mrf.mxu0  ;;  %v517_v32 = vpack.c.bf16 %v2358_v56, %v2357_v29  ;;  %v247_v29 = vld [vmem:[%s3137_s4 + $0xa] sm:$0xff] }
 0x149   : > { %v841_v48 = vadd.f32 %v840_v5, %v3432_v19  ;;  %v3612_v5 = vpack.c.bf16 %v213_v49, %v212_v41 }
 0x14a   : > { %v1160_v10 = vadd.f32 %v1159_v9, %v927_v37 }
 0x14b   : > { %879 = vmatmul.bf16.gmra.mxu1 %v514_v38  ;;  %1290 = vmatmul.bf16.gmra.mxu0 %v511_v63  ;;  %v2390_v63 = vld [vmem:[%s3137_s4 + $0x18a] sm:$0xff] }
 0x14c   : > { %968 = vmatmul.bf16.gmra.mxu2 %v515_v14  ;;  %1201 = vmatmul.bf16.gmra.mxu3 %v3597_v45  ;;  %v3600_v42 = vadd.f32 %v1248_v20, %v1160_v10  ;;  %v518_v37 = vpack.c.bf16 %v2390_v63, %v2389_v4  ;;  %v2631_v4 = vld [vmem:[%s3137_s4 + $0x30] sm:$0xff]  ;;  %v2632_v63 = vld [vmem:[%s3137_s4 + $0x38] sm:$0xff] }
 0x14f   : > { %v929_v57 = vpop.f32.mrf.mxu2  ;;  %v1162_v13 = vpop.f32.mrf.mxu3 }
 0x150   : > { %v930_v52 = vadd.f32 %v929_v57, %v841_v48  ;;  %v842_v31 = vpop.f32.mrf.mxu1  ;;  %v1253_v62 = vpop.f32.mrf.mxu0 }
 0x151   : > { %v843_v8 = vadd.f32 %v842_v31, %v3447_v18 }
 0x152   : > { %v1163_v61 = vadd.f32 %v1162_v13, %v930_v52 }
 0x154   : > { %v3606_v7 = vadd.f32 %v1251_v44, %v1163_v61  ;;  %v246_v61 = vld [vmem:[%s3137_s4 + $0x2] sm:$0xff] }
 0x157   : > { %v931_v20 = vpop.f32.mrf.mxu2  ;;  %v1164_v53 = vpop.f32.mrf.mxu3 }
 0x158   : > { %v932_v19 = vadd.f32 %v931_v20, %v843_v8  ;;  %v845_v1 = vpop.f32.mrf.mxu1  ;;  %v1256_v9 = vpop.f32.mrf.mxu0 }
 0x159   : > { %v846_v44 = vadd.f32 %v845_v1, %v3465_v6 }
 0x15a   : > { %v1165_v14 = vadd.f32 %v1164_v53, %v932_v19  ;;  %v1487_v53 = vpack.c.bf16 %v2632_v63, %v2631_v4 }
 0x15b   : > { %884 = vmatmul.bf16.gmra.mxu1 %v517_v32  ;;  %1295 = vmatmul.bf16.gmra.mxu0 %v514_v38 }
 0x15c   : > { %973 = vmatmul.bf16.gmra.mxu2 %v518_v37  ;;  %1206 = vmatmul.bf16.gmra.mxu3 %v3612_v5  ;;  %v3615_v18 = vadd.f32 %v1253_v62, %v1165_v14  ;;  %v280_v62 = vpack.c.bf16 %v247_v29, %v246_v61  ;;  %v2665_v29 = vld [vmem:[%s3137_s4 + $0x49] sm:$0xff] }
 0x15f   : > { %v934_v10 = vpop.f32.mrf.mxu2  ;;  %v1167_v48 = vpop.f32.mrf.mxu3 }
 0x160   : > { %v935_v57 = vadd.f32 %v934_v10, %v846_v44  ;;  %v847_v13 = vpop.f32.mrf.mxu1  ;;  %v1258_v52 = vpop.f32.mrf.mxu0 }
 0x161   : > { %v848_v38 = vadd.f32 %v847_v13, %v3474_v16  ;;  %v2633_v13 = vld [vmem:[%s3137_s4 + $0x48] sm:$0xff] }
 0x162   : > { %v1168_v31 = vadd.f32 %v1167_v48, %v935_v57  ;;  %v248_v48 = vld [vmem:[%s3137_s4 + $0x1a] sm:$0xff]  ;;  %v249_v57 = vld [vmem:[%s3137_s4 + $0x22] sm:$0xff] }
 0x164   : > { %v3620_v56 = vadd.f32 %v1256_v9, %v1168_v31  ;;  %v2698_v31 = vld [vmem:[%s3137_s4 + $0x52] sm:$0xff] }
 0x167   : > { %v936_v41 = vpop.f32.mrf.mxu2  ;;  %v1169_v49 = vpop.f32.mrf.mxu3 }
 0x168   : > { %v937_v8 = vadd.f32 %v936_v41, %v848_v38  ;;  %v850_v20 = vpop.f32.mrf.mxu1  ;;  %v1261_v6 = vpop.f32.mrf.mxu0  ;;  %v283_v38 = vpack.c.bf16 %v249_v57, %v248_v48  ;;  %v250_v48 = vld [vmem:[%s3137_s4 + $0x32] sm:$0xff]  ;;  %v251_v57 = vld [vmem:[%s3137_s4 + $0x3a] sm:$0xff] }
 0x169   : > { %v851_v19 = vadd.f32 %v850_v20, %v3387_v21 }
 0x16a   : > { %v1170_v32 = vadd.f32 %v1169_v49, %v937_v8 }
 0x16b   : > { %1309 = vmatmul.bf16.vlgmr.msra.gmra.mxu1 %v280_v62  ;;  %1914 = vmatmul.bf16.vlgmr.msra.gmra.mxu0 %v3344_v55  ;;  %v2697_v55 = vld [vmem:[%s3137_s4 + $0x4a] sm:$0xff] }
 0x16c   : > { %1736 = vmatmul.bf16.vlgmr.msra.gmra.mxu2 %v1487_v53  ;;  %1825 = vmatmul.bf16.vlgmr.msra.gmra.mxu3 %v3342_v54  ;;  %v3627_v16 = vadd.f32 %v1258_v52, %v1170_v32  ;;  %v2634_v54 = vld [vmem:[%s3137_s4 + $0x50] sm:$0xff]  ;;  %v3641_v41 = vpack.c.bf16 %v2698_v31, %v2697_v55  ;;  %v2699_v55 = vld [vmem:[%s3137_s4 + $0x62] sm:$0xff] }
 0x16d   : > { %v2666_v52 = vld [vmem:[%s3137_s4 + $0x51] sm:$0xff]  ;;  %v1490_v20 = vpack.c.bf16 %v2634_v54, %v2633_v13  ;;  %v2635_v13 = vld [vmem:[%s3137_s4 + $0x60] sm:$0xff] }
 0x16e   : > { %v1491_v53 = vpack.c.bf16 %v2666_v52, %v2665_v29  ;;  %v2700_v31 = vld [vmem:[%s3137_s4 + $0x6a] sm:$0xff]  ;;  %v2667_v52 = vld [vmem:[%s3137_s4 + $0x61] sm:$0xff] }
 0x16f   : > { %v939_v1 = vpop.f32.mrf.mxu2  ;;  %v1172_v9 = vpop.f32.mrf.mxu3  ;;  %v2636_v29 = vld [vmem:[%s3137_s4 + $0x68] sm:$0xff] }
 0x170   : > { %v940_v37 = vadd.f32 %v939_v1, %v851_v19  ;;  %v852_v14 = vpop.f32.mrf.mxu1  ;;  %v1263_v44 = vpop.f32.mrf.mxu0 }
 0x171   : > { %v853_v4 = vadd.f32 %v852_v14, %v3405_v33 }
 0x172   : > { %v1173_v10 = vadd.f32 %v1172_v9, %v940_v37 }
 0x174   : > { %v3635_v61 = vadd.f32 %v1261_v6, %v1173_v10 }
 0x177   : > { %v941_v63 = vpop.f32.mrf.mxu2  ;;  %v1174_v21 = vpop.f32.mrf.mxu3 }
 0x178   : > { %v942_v49 = vadd.f32 %v941_v63, %v853_v4  ;;  %v855_v62 = vpop.f32.mrf.mxu1  ;;  %v1266_v8 = vpop.f32.mrf.mxu0 }
 0x179   : > { %v856_v32 = vadd.f32 %v855_v62, %v3414_v39 }
 0x17a   : > { %v1175_v6 = vadd.f32 %v1174_v21, %v942_v49  ;;  %v286_v21 = vpack.c.bf16 %v251_v57, %v250_v48  ;;  %v2637_v57 = vld [vmem:[%s3137_s4 + $0x78] sm:$0xff] }
 0x17b   : > { %1314 = vmatmul.bf16.gmra.mxu1 %v283_v38  ;;  %1919 = vmatmul.bf16.gmra.mxu0 %v3641_v41  ;;  %v3658_v38 = vpack.c.bf16 %v2700_v31, %v2699_v55  ;;  %v2702_v55 = vld [vmem:[%s3137_s4 + $0x82] sm:$0xff] }
 0x17c   : > { %1741 = vmatmul.bf16.gmra.mxu2 %v1490_v20  ;;  %1830 = vmatmul.bf16.gmra.mxu3 %v1491_v53  ;;  %v3644_v33 = vadd.f32 %v1263_v44, %v1175_v6  ;;  %v2668_v44 = vld [vmem:[%s3137_s4 + $0x69] sm:$0xff]  ;;  %v1493_v53 = vpack.c.bf16 %v2636_v29, %v2635_v13  ;;  %v2701_v13 = vld [vmem:[%s3137_s4 + $0x7a] sm:$0xff] }
 0x17d   : > { %v1494_v6 = vpack.c.bf16 %v2668_v44, %v2667_v52  ;;  %v2638_v29 = vld [vmem:[%s3137_s4 + $0x80] sm:$0xff] }
 0x17e   : > { %v2669_v52 = vld [vmem:[%s3137_s4 + $0x79] sm:$0xff]  ;;  %v2670_v44 = vld [vmem:[%s3137_s4 + $0x81] sm:$0xff] }
 0x17f   : > { %v944_v19 = vpop.f32.mrf.mxu2  ;;  %v1177_v1 = vpop.f32.mrf.mxu3 }
 0x180   : > { %v945_v9 = vadd.f32 %v944_v19, %v856_v32  ;;  %v857_v37 = vpop.f32.mrf.mxu1  ;;  %v1268_v14 = vpop.f32.mrf.mxu0 }
 0x181   : > { %v858_v4 = vadd.f32 %v857_v37, %v3426_v50 }
 0x182   : > { %v1178_v10 = vadd.f32 %v1177_v1, %v945_v9 }
 0x184   : > { %v3652_v54 = vadd.f32 %v1266_v8, %v1178_v10 }
 0x187   : > { %v946_v63 = vpop.f32.mrf.mxu2  ;;  %v1179_v39 = vpop.f32.mrf.mxu3 }
 0x188   : > { %v947_v49 = vadd.f32 %v946_v63, %v858_v4  ;;  %v860_v62 = vpop.f32.mrf.mxu1  ;;  %v1271_v20 = vpop.f32.mrf.mxu0 }
 0x189   : > { %v861_v32 = vadd.f32 %v860_v62, %v3441_v59  ;;  %v1496_v62 = vpack.c.bf16 %v2638_v29, %v2637_v57  ;;  %v2703_v57 = vld [vmem:[%s3137_s4 + $0x92] sm:$0xff] }
 0x18a   : > { %v1180_v8 = vadd.f32 %v1179_v39, %v947_v49  ;;  %v3673_v39 = vpack.c.bf16 %v2702_v55, %v2701_v13  ;;  %v2640_v55 = vld [vmem:[%s3137_s4 + $0x98] sm:$0xff] }
 0x18b   : > { %1319 = vmatmul.bf16.gmra.mxu1 %v286_v21  ;;  %1924 = vmatmul.bf16.gmra.mxu0 %v3658_v38  ;;  %v2671_v29 = vld [vmem:[%s3137_s4 + $0x91] sm:$0xff] }
 0x18c   : > { %1746 = vmatmul.bf16.gmra.mxu2 %v1493_v53  ;;  %1835 = vmatmul.bf16.gmra.mxu3 %v1494_v6  ;;  %v3661_v50 = vadd.f32 %v1268_v14, %v1180_v8  ;;  %v1497_v53 = vpack.c.bf16 %v2670_v44, %v2669_v52  ;;  %v2672_v52 = vld [vmem:[%s3137_s4 + $0x99] sm:$0xff] }
 0x18f   : > { %v949_v19 = vpop.f32.mrf.mxu2  ;;  %v1182_v1 = vpop.f32.mrf.mxu3 }
 0x190   : > { %v950_v9 = vadd.f32 %v949_v19, %v861_v32  ;;  %v862_v37 = vpop.f32.mrf.mxu1  ;;  %v1273_v10 = vpop.f32.mrf.mxu0 }
 0x191   : > { %v863_v4 = vadd.f32 %v862_v37, %v3459_v2 }
 0x192   : > { %v1183_v48 = vadd.f32 %v1182_v1, %v950_v9 }
 0x194   : > { %v3667_v31 = vadd.f32 %v1271_v20, %v1183_v48  ;;  %v2639_v48 = vld [vmem:[%s3137_s4 + $0x90] sm:$0xff] }
 0x197   : > { %v951_v14 = vpop.f32.mrf.mxu2  ;;  %v1184_v63 = vpop.f32.mrf.mxu3 }
 0x198   : > { %v952_v59 = vadd.f32 %v951_v14, %v863_v4  ;;  %v865_v21 = vpop.f32.mrf.mxu1  ;;  %v1276_v49 = vpop.f32.mrf.mxu0 }
 0x199   : > { %v866_v20 = vadd.f32 %v865_v21, %v3468_v11  ;;  %v1499_v21 = vpack.c.bf16 %v2640_v55, %v2639_v48  ;;  %v2705_v48 = vld [vmem:[%s3137_s4 + $0xaa] sm:$0xff] }
 0x19a   : > { %v1185_v6 = vadd.f32 %v1184_v63, %v952_v59  ;;  %v2673_v55 = vld [vmem:[%s3137_s4 + $0xa9] sm:$0xff] }
 0x19b   : > { %1324 = vmatmul.bf16.gmra.mxu1 %v3641_v41  ;;  %1929 = vmatmul.bf16.gmra.mxu0 %v3673_v39  ;;  %v2704_v41 = vld [vmem:[%s3137_s4 + $0x9a] sm:$0xff] }
 0x19c   : > { %1751 = vmatmul.bf16.gmra.mxu2 %v1496_v62  ;;  %1840 = vmatmul.bf16.gmra.mxu3 %v1497_v53  ;;  %v3677_v2 = vadd.f32 %v1273_v10, %v1185_v6  ;;  %v3689_v14 = vpack.c.bf16 %v2704_v41, %v2703_v57  ;;  %v1500_v62 = vpack.c.bf16 %v2672_v52, %v2671_v29  ;;  %v2642_v41 = vld [vmem:[%s3137_s4 + $0xb0] sm:$0xff] }
 0x19d   : > { %v2674_v29 = vld [vmem:[%s3137_s4 + $0xb1] sm:$0xff] }
 0x19f   : > { %v954_v8 = vpop.f32.mrf.mxu2  ;;  %v1187_v32 = vpop.f32.mrf.mxu3 }
 0x1a0   : > { %v955_v19 = vadd.f32 %v954_v8, %v866_v20  ;;  %v867_v1 = vpop.f32.mrf.mxu1  ;;  %v1278_v9 = vpop.f32.mrf.mxu0 }
 0x1a1   : > { %v868_v44 = vadd.f32 %v867_v1, %v3480_v27 }
 0x1a2   : > { %v1188_v37 = vadd.f32 %v1187_v32, %v955_v19 }
 0x1a4   : > { %v3683_v13 = vadd.f32 %v1276_v49, %v1188_v37  ;;  %v2641_v37 = vld [vmem:[%s3137_s4 + $0xa8] sm:$0xff] }
 0x1a7   : > { %v956_v10 = vpop.f32.mrf.mxu2  ;;  %v1189_v4 = vpop.f32.mrf.mxu3 }
 0x1a8   : > { %v957_v11 = vadd.f32 %v956_v10, %v868_v44  ;;  %v870_v63 = vpop.f32.mrf.mxu1  ;;  %v1281_v59 = vpop.f32.mrf.mxu0 }
 0x1a9   : > { %v871_v49 = vadd.f32 %v870_v63, %v3389_v22  ;;  %v1502_v63 = vpack.c.bf16 %v2642_v41, %v2641_v37  ;;  %v2707_v37 = vld [vmem:[%s3137_s4 + $0xc2] sm:$0xff] }
 0x1aa   : > { %v1190_v53 = vadd.f32 %v1189_v4, %v957_v11  ;;  %v2675_v41 = vld [vmem:[%s3137_s4 + $0xc1] sm:$0xff] }
 0x1ab   : > { %1329 = vmatmul.bf16.gmra.mxu1 %v3658_v38  ;;  %1934 = vmatmul.bf16.gmra.mxu0 %v3689_v14  ;;  %v2706_v38 = vld [vmem:[%s3137_s4 + $0xb2] sm:$0xff] }
 0x1ac   : > { %1756 = vmatmul.bf16.gmra.mxu2 %v1499_v21  ;;  %1845 = vmatmul.bf16.gmra.mxu3 %v1500_v62  ;;  %v3693_v27 = vadd.f32 %v1278_v9, %v1190_v53  ;;  %v3705_v10 = vpack.c.bf16 %v2706_v38, %v2705_v48  ;;  %v1503_v21 = vpack.c.bf16 %v2674_v29, %v2673_v55  ;;  %v2644_v38 = vld [vmem:[%s3137_s4 + $0xc8] sm:$0xff] }
 0x1ad   : > { %v2676_v55 = vld [vmem:[%s3137_s4 + $0xc9] sm:$0xff] }
 0x1af   : > { %v959_v6 = vpop.f32.mrf.mxu2  ;;  %v1192_v20 = vpop.f32.mrf.mxu3 }
 0x1b0   : > { %v960_v8 = vadd.f32 %v959_v6, %v871_v49  ;;  %v872_v32 = vpop.f32.mrf.mxu1  ;;  %v1283_v19 = vpop.f32.mrf.mxu0 }
 0x1b1   : > { %v873_v52 = vadd.f32 %v872_v32, %v3407_v34 }
 0x1b2   : > { %v1193_v1 = vadd.f32 %v1192_v20, %v960_v8 }
 0x1b4   : > { %v3699_v57 = vadd.f32 %v1281_v59, %v1193_v1  ;;  %v2643_v1 = vld [vmem:[%s3137_s4 + $0xc0] sm:$0xff] }
 0x1b7   : > { %v961_v9 = vpop.f32.mrf.mxu2  ;;  %v1194_v44 = vpop.f32.mrf.mxu3 }
 0x1b8   : > { %v962_v22 = vadd.f32 %v961_v9, %v873_v52  ;;  %v875_v4 = vpop.f32.mrf.mxu1  ;;  %v1286_v11 = vpop.f32.mrf.mxu0 }
 0x1b9   : > { %v876_v59 = vadd.f32 %v875_v4, %v3416_v40  ;;  %v1505_v4 = vpack.c.bf16 %v2644_v38, %v2643_v1  ;;  %v2709_v1 = vld [vmem:[%s3137_s4 + $0xda] sm:$0xff] }
 0x1ba   : > { %v1195_v62 = vadd.f32 %v1194_v44, %v962_v22  ;;  %v2677_v38 = vld [vmem:[%s3137_s4 + $0xd9] sm:$0xff] }
 0x1bb   : > { %1334 = vmatmul.bf16.gmra.mxu1 %v3673_v39  ;;  %1939 = vmatmul.bf16.gmra.mxu0 %v3705_v10  ;;  %v2708_v39 = vld [vmem:[%s3137_s4 + $0xca] sm:$0xff] }
 0x1bc   : > { %1761 = vmatmul.bf16.gmra.mxu2 %v1502_v63  ;;  %1850 = vmatmul.bf16.gmra.mxu3 %v1503_v21  ;;  %v3709_v34 = vadd.f32 %v1283_v19, %v1195_v62  ;;  %v1507_v9 = vpack.c.bf16 %v2708_v39, %v2707_v37  ;;  %v1506_v63 = vpack.c.bf16 %v2676_v55, %v2675_v41  ;;  %v2710_v37 = vld [vmem:[%s3137_s4 + $0xe2] sm:$0xff] }
 0x1bd   : > { %v2646_v39 = vld [vmem:[%s3137_s4 + $0xe0] sm:$0xff] }
 0x1be   : > { %v2678_v41 = vld [vmem:[%s3137_s4 + $0xe1] sm:$0xff] }
 0x1bf   : > { %v964_v53 = vpop.f32.mrf.mxu2  ;;  %v1197_v49 = vpop.f32.mrf.mxu3 }
 0x1c0   : > { %v965_v6 = vadd.f32 %v964_v53, %v876_v59  ;;  %v877_v20 = vpop.f32.mrf.mxu1  ;;  %v1288_v8 = vpop.f32.mrf.mxu0 }
 0x1c1   : > { %v878_v29 = vadd.f32 %v877_v20, %v3428_v51 }
 0x1c2   : > { %v1198_v32 = vadd.f32 %v1197_v49, %v965_v6 }
 0x1c4   : > { %v3715_v48 = vadd.f32 %v1286_v11, %v1198_v32  ;;  %v2645_v32 = vld [vmem:[%s3137_s4 + $0xd8] sm:$0xff] }
 0x1c7   : > { %v966_v19 = vpop.f32.mrf.mxu2  ;;  %v1199_v52 = vpop.f32.mrf.mxu3 }
 0x1c8   : > { %v967_v40 = vadd.f32 %v966_v19, %v878_v29  ;;  %v880_v44 = vpop.f32.mrf.mxu1  ;;  %v1291_v22 = vpop.f32.mrf.mxu0  ;;  %v1510_v19 = vpack.c.bf16 %v2710_v37, %v2709_v1  ;;  %v2648_v1 = vld [vmem:[%s3137_s4 + $0xf8] sm:$0xff] }
 0x1c9   : > { %v881_v11 = vadd.f32 %v880_v44, %v3443_v60  ;;  %v1508_v44 = vpack.c.bf16 %v2646_v39, %v2645_v32  ;;  %v2647_v32 = vld [vmem:[%s3137_s4 + $0xf0] sm:$0xff] }
 0x1ca   : > { %v1200_v21 = vadd.f32 %v1199_v52, %v967_v40 }
 0x1cb   : > { %1339 = vmatmul.bf16.gmra.mxu1 %v3689_v14  ;;  %1944 = vmatmul.bf16.gmra.mxu0 %v1507_v9 }
 0x1cc   : > { %1766 = vmatmul.bf16.gmra.mxu2 %v1505_v4  ;;  %1855 = vmatmul.bf16.gmra.mxu3 %v1506_v63  ;;  %v3722_v51 = vadd.f32 %v1288_v8, %v1200_v21  ;;  %v1509_v4 = vpack.c.bf16 %v2678_v41, %v2677_v38  ;;  %v1511_v41 = vpack.c.bf16 %v2648_v1, %v2647_v32 }
 0x1cf   : > { %v969_v62 = vpop.f32.mrf.mxu2  ;;  %v1202_v59 = vpop.f32.mrf.mxu3 }
 0x1d0   : > { %v970_v53 = vadd.f32 %v969_v62, %v881_v11  ;;  %v882_v49 = vpop.f32.mrf.mxu1  ;;  %v1293_v6 = vpop.f32.mrf.mxu0 }
 0x1d1   : > { %v883_v55 = vadd.f32 %v882_v49, %v3461_v3 }
 0x1d2   : > { %v1203_v20 = vadd.f32 %v1202_v59, %v970_v53 }
 0x1d4   : > { %v3728_v14 = vadd.f32 %v1291_v22, %v1203_v20 }
 0x1d7   : > { %v971_v8 = vpop.f32.mrf.mxu2  ;;  %v1204_v29 = vpop.f32.mrf.mxu3 }
 0x1d8   : > { %v972_v60 = vadd.f32 %v971_v8, %v883_v55  ;;  %v885_v52 = vpop.f32.mrf.mxu1  ;;  %v1296_v40 = vpop.f32.mrf.mxu0 }
 0x1d9   : > { %v886_v3 = vadd.f32 %v885_v52, %v3470_v12 }
 0x1da   : > { %v1205_v63 = vadd.f32 %v1204_v29, %v972_v60 }
 0x1db   : > { %1344 = vmatmul.bf16.gmra.mxu1 %v3705_v10  ;;  %1949 = vmatmul.bf16.gmra.mxu0 %v1510_v19 }
 0x1dc   : > { %1771 = vmatmul.bf16.gmra.mxu2 %v1508_v44  ;;  %1860 = vmatmul.bf16.gmra.mxu3 %v1509_v4  ;;  %v3735_v22 = vadd.f32 %v1293_v6, %v1205_v63  ;;  %v2649_v44 = vld [vmem:[%s3137_s4 + $0x108] sm:$0xff]  ;;  %v2714_v63 = vld [vmem:[%s3137_s4 + $0x112] sm:$0xff] }
 0x1dd   : > { %v2713_v4 = vld [vmem:[%s3137_s4 + $0x10a] sm:$0xff] }
 0x1df   : > { %v974_v21 = vpop.f32.mrf.mxu2  ;;  %v1207_v11 = vpop.f32.mrf.mxu3 }
 0x1e0   : > { %v975_v62 = vadd.f32 %v974_v21, %v886_v3  ;;  %v887_v59 = vpop.f32.mrf.mxu1  ;;  %v1298_v53 = vpop.f32.mrf.mxu0  ;;  %v2650_v3 = vld [vmem:[%s3137_s4 + $0x110] sm:$0xff] }
 0x1e1   : > { %v888_v37 = vadd.f32 %v887_v59, %v3482_v30  ;;  %v2681_v21 = vld [vmem:[%s3137_s4 + $0x109] sm:$0xff]  ;;  %v3753_v59 = vpack.c.bf16 %v2714_v63, %v2713_v4  ;;  %v1514_v1 = vpack.c.bf16 %v2650_v3, %v2649_v44  ;;  %v266_v4 = vld [vmem:[%s3137_s4 + $0xf2] sm:$0xff]  ;;  %v267_v63 = vld [vmem:[%s3137_s4 + $0xfa] sm:$0xff] }
 0x1e2   : > { %v1208_v49 = vadd.f32 %v1207_v11, %v975_v62  ;;  %v2682_v11 = vld [vmem:[%s3137_s4 + $0x111] sm:$0xff] }
 0x1e4   : > { %v3738_v20 = vadd.f32 %v1296_v40, %v1208_v49 }
 0x1e7   : > { %v976_v10 = vpop.f32.mrf.mxu2  ;;  %v1209_v39 = vpop.f32.mrf.mxu3 }
 0x1e8   : > { %v977_v38 = vadd.f32 %v976_v10, %v888_v37  ;;  %v1310_v6 = vpop.f32.mrf.mxu1  ;;  %v1915_v12 = vpop.f32.mrf.mxu0  ;;  %v1515_v37 = vpack.c.bf16 %v2682_v11, %v2681_v21  ;;  %v2651_v21 = vld [vmem:[%s3137_s4 + $0x120] sm:$0xff] }
 0x1e9   : > { %v2715_v11 = vld [vmem:[%s3137_s4 + $0x122] sm:$0xff] }
 0x1ea   : > { %v1210_v55 = vadd.f32 %v1209_v39, %v977_v38 }
 0x1eb   : > { %1349 = vmatmul.bf16.gmra.mxu1 %v1507_v9  ;;  %1954 = vmatmul.bf16.gmra.mxu0 %v3507_v26 }
 0x1ec   : > { %1776 = vmatmul.bf16.gmra.mxu2 %v1511_v41  ;;  %1865 = vmatmul.bf16.gmra.mxu3 %v3505_v23  ;;  %v3745_v30 = vadd.f32 %v1298_v53, %v1210_v55  ;;  %v1311_v23 = vadd.f32 %v1310_v6, %v3501_v46 }
 0x1ef   : > { %v1737_v8 = vpop.f32.mrf.mxu2  ;;  %v1826_v29 = vpop.f32.mrf.mxu3 }
 0x1f0   : > { %v1312_v60 = vpop.f32.mrf.mxu1  ;;  %v1917_v52 = vpop.f32.mrf.mxu0  ;;  %v1827_v40 = vadd.f32 %v1826_v29, %v1737_v8 }
 0x1f1   : > { %v1313_v39 = vadd.f32 %v1312_v60, %v3513_v35 }
 0x1f2   : > { %v1916_v9 = vadd.f32 %v1915_v12, %v1827_v40 }
 0x1f4   : > { %v1995_v10 = vadd.f32 %v1916_v9, %v1311_v23  ;;  %v2716_v9 = vld [vmem:[%s3137_s4 + $0x12a] sm:$0xff] }
 0x1f5   : > { %v2684_v23 = vld [vmem:[%s3137_s4 + $0x129] sm:$0xff] }
 0x1f6   : > { %v2128_v46 = vmul.f32 %v1995_v10, %v1995_v10 }
 0x1f7   : > { %v1739_v62 = vpop.f32.mrf.mxu2  ;;  %v1828_v26 = vpop.f32.mrf.mxu3 }
 0x1f8   : > { %v1829_v53 = vadd.f32 %v1828_v26, %v1739_v62  ;;  %v1315_v49 = vpop.f32.mrf.mxu1  ;;  %v1920_v32 = vpop.f32.mrf.mxu0  ;;  %v2652_v62 = vld [vmem:[%s3137_s4 + $0x128] sm:$0xff] }
 0x1f9   : > { %v1316_v40 = vadd.f32 %v1315_v49, %v3518_v28  ;;  %v2683_v26 = vld [vmem:[%s3137_s4 + $0x121] sm:$0xff] }
 0x1fa   : > { %v1918_v38 = vadd.f32 %v1917_v52, %v1829_v53 }
 0x1fb   : > { %1354 = vmatmul.bf16.gmra.mxu1 %v1510_v19  ;;  %1959 = vmatmul.bf16.gmra.mxu0 %v3753_v59 }
 0x1fc   : > { %v1996_v12 = vadd.f32 %v1918_v38, %v1313_v39  ;;  %1781 = vmatmul.bf16.gmra.mxu2 %v1514_v1  ;;  %1870 = vmatmul.bf16.gmra.mxu3 %v1515_v37  ;;  %v310_v39 = vpack.c.bf16 %v267_v63, %v266_v4  ;;  %v3774_v38 = vpack.c.bf16 %v2716_v9, %v2715_v11  ;;  %v2717_v9 = vld [vmem:[%s3137_s4 + $0x13a] sm:$0xff] }
 0x1fe   : > { %v2949_v6 = vpack.c.bf16 %v1996_v12, %v1995_v10  ;;  %v2091_v35 = vadd.f32 %v1996_v12, %v1995_v10  ;;  %v2129_v19 = vmul.f32 %v1996_v12, %v1996_v12 }
 0x1ff   : > { %v1742_v41 = vpop.f32.mrf.mxu2  ;;  %v1831_v55 = vpop.f32.mrf.mxu3 }
 0x200   : > { %2950 = vst [vmem:[%s3762_s20] sm:$0xff] %v2949_v6   ;;  %v2160_v8 = vadd.f32 %v2129_v19, %v2128_v46  ;;  %v1832_v29 = vadd.f32 %v1831_v55, %v1742_v41  ;;  %v1317_v60 = vpop.f32.mrf.mxu1  ;;  %v1922_v52 = vpop.f32.mrf.mxu0  ;;  %v1518_v6 = vpack.c.bf16 %v2684_v23, %v2683_v26  ;;  %v2685_v26 = vld [vmem:[%s3137_s4 + $0x139] sm:$0xff]  ;;  %v2686_v23 = vld [vmem:[%s3137_s4 + $0x141] sm:$0xff] }
 0x201   : > { %v1318_v19 = vadd.f32 %v1317_v60, %v3531_v17 }
 0x202   : > { %v1921_v44 = vadd.f32 %v1920_v32, %v1832_v29  ;;  %v1517_v32 = vpack.c.bf16 %v2652_v62, %v2651_v21  ;;  %v2718_v62 = vld [vmem:[%s3137_s4 + $0x142] sm:$0xff] }
 0x204   : > { %v1997_v3 = vadd.f32 %v1921_v44, %v1316_v40 }
 0x206   : > { %v2092_v53 = vadd.f32 %v2091_v35, %v1997_v3  ;;  %v2130_v1 = vmul.f32 %v1997_v3, %v1997_v3 }
 0x207   : > { %v1744_v37 = vpop.f32.mrf.mxu2  ;;  %v1833_v10 = vpop.f32.mrf.mxu3 }
 0x208   : > { %v2161_v12 = vadd.f32 %v2160_v8, %v2130_v1  ;;  %v1834_v46 = vadd.f32 %v1833_v10, %v1744_v37  ;;  %v1320_v28 = vpop.f32.mrf.mxu1  ;;  %v1925_v49 = vpop.f32.mrf.mxu0  ;;  %v3784_v10 = vpack.c.bf16 %v2718_v62, %v2717_v9 }
 0x20a   : > { %v1923_v41 = vadd.f32 %v1922_v52, %v1834_v46  ;;  %v1321_v52 = vadd.f32 %v1320_v28, %v3542_v36 }
 0x20b   : > { %1359 = vmatmul.bf16.gmra.mxu1 %v310_v39  ;;  %1964 = vmatmul.bf16.gmra.mxu0 %v3774_v38 }
 0x20c   : > { %v1998_v35 = vadd.f32 %v1923_v41, %v1318_v19  ;;  %1786 = vmatmul.bf16.gmra.mxu2 %v1517_v32  ;;  %1875 = vmatmul.bf16.gmra.mxu3 %v1518_v6  ;;  %v1521_v6 = vpack.c.bf16 %v2686_v23, %v2685_v26 }
 0x20e   : > { %v2954_v55 = vpack.c.bf16 %v1998_v35, %v1997_v3  ;;  %v2093_v8 = vadd.f32 %v2092_v53, %v1998_v35  ;;  %v2131_v29 = vmul.f32 %v1998_v35, %v1998_v35 }
 0x20f   : > { %v1747_v40 = vpop.f32.mrf.mxu2  ;;  %v1836_v44 = vpop.f32.mrf.mxu3 }
 0x210   : > { %3026 = vst [vmem:[%s3762_s20 + $0x8] sm:$0xff] %v2954_v55   ;;  %v2162_v4 = vadd.f32 %v2161_v12, %v2131_v29  ;;  %v1837_v63 = vadd.f32 %v1836_v44, %v1747_v40  ;;  %v1322_v17 = vpop.f32.mrf.mxu1  ;;  %v1927_v60 = vpop.f32.mrf.mxu0 }
 0x211   : > { %v1323_v36 = vadd.f32 %v1322_v17, %v3548_v0  ;;  %v2719_v17 = vld [vmem:[%s3137_s4 + $0x152] sm:$0xff] }
 0x212   : > { %v1926_v21 = vadd.f32 %v1925_v49, %v1837_v63 }
 0x214   : > { %v1999_v11 = vadd.f32 %v1926_v21, %v1321_v52  ;;  %v2688_v52 = vld [vmem:[%s3137_s4 + $0x159] sm:$0xff] }
 0x216   : > { %v2094_v1 = vadd.f32 %v2093_v8, %v1999_v11  ;;  %v2132_v3 = vmul.f32 %v1999_v11, %v1999_v11 }
 0x217   : > { %v1749_v37 = vpop.f32.mrf.mxu2  ;;  %v1838_v53 = vpop.f32.mrf.mxu3 }
 0x218   : > { %v2163_v39 = vadd.f32 %v2162_v4, %v2132_v3  ;;  %v1839_v46 = vadd.f32 %v1838_v53, %v1749_v37  ;;  %v1325_v12 = vpop.f32.mrf.mxu1  ;;  %v1930_v32 = vpop.f32.mrf.mxu0 }
 0x219   : > { %v1326_v44 = vadd.f32 %v1325_v12, %v3553_v43 }
 0x21a   : > { %v1928_v28 = vadd.f32 %v1927_v60, %v1839_v46  ;;  %v2687_v60 = vld [vmem:[%s3137_s4 + $0x151] sm:$0xff] }
 0x21b   : > { %1364 = vmatmul.bf16.gmra.mxu1 %v3753_v59  ;;  %1969 = vmatmul.bf16.gmra.mxu0 %v3784_v10  ;;  %v1524_v53 = vpack.c.bf16 %v2688_v52, %v2687_v60 }
 0x21c   : > { %v2000_v49 = vadd.f32 %v1928_v28, %v1323_v36  ;;  %1791 = vmatmul.bf16.gmra.mxu2 %v3582_v58  ;;  %1880 = vmatmul.bf16.gmra.mxu3 %v1521_v6  ;;  %v2720_v58 = vld [vmem:[%s3137_s4 + $0x15a] sm:$0xff] }
 0x21d   : > { %v3796_v26 = vpack.c.bf16 %v2720_v58, %v2719_v17 }
 0x21e   : > { %v2959_v19 = vpack.c.bf16 %v2000_v49, %v1999_v11  ;;  %v2095_v41 = vadd.f32 %v2094_v1, %v2000_v49  ;;  %v2133_v35 = vmul.f32 %v2000_v49, %v2000_v49 }
 0x21f   : > { %v1752_v55 = vpop.f32.mrf.mxu2  ;;  %v1841_v8 = vpop.f32.mrf.mxu3 }
 0x220   : > { %3027 = vst [vmem:[%s3762_s20 + $0x10] sm:$0xff] %v2959_v19   ;;  %v2164_v0 = vadd.f32 %v2163_v39, %v2133_v35  ;;  %v1842_v29 = vadd.f32 %v1841_v8, %v1752_v55  ;;  %v1327_v40 = vpop.f32.mrf.mxu1  ;;  %v1932_v59 = vpop.f32.mrf.mxu0  ;;  %v2721_v8 = vld [vmem:[%s3137_s4 + $0x16a] sm:$0xff] }
 0x221   : > { %v1328_v43 = vadd.f32 %v1327_v40, %v3564_v47 }
 0x222   : > { %v1931_v4 = vadd.f32 %v1930_v32, %v1842_v29  ;;  %v2690_v29 = vld [vmem:[%s3137_s4 + $0x171] sm:$0xff] }
 0x224   : > { %v2001_v63 = vadd.f32 %v1931_v4, %v1326_v44 }
 0x226   : > { %v2096_v21 = vadd.f32 %v2095_v41, %v2001_v63  ;;  %v2134_v11 = vmul.f32 %v2001_v63, %v2001_v63 }
 0x227   : > { %v1754_v9 = vpop.f32.mrf.mxu2  ;;  %v1843_v62 = vpop.f32.mrf.mxu3 }
 0x228   : > { %v2165_v23 = vadd.f32 %v2164_v0, %v2134_v11  ;;  %v1844_v1 = vadd.f32 %v1843_v62, %v1754_v9  ;;  %v1330_v3 = vpop.f32.mrf.mxu1  ;;  %v1935_v37 = vpop.f32.mrf.mxu0  ;;  %v2689_v0 = vld [vmem:[%s3137_s4 + $0x169] sm:$0xff] }
 0x229   : > { %v1331_v41 = vadd.f32 %v1330_v3, %v3576_v25 }
 0x22a   : > { %v1933_v39 = vadd.f32 %v1932_v59, %v1844_v1 }
 0x22b   : > { %1369 = vmatmul.bf16.gmra.mxu1 %v3774_v38  ;;  %1974 = vmatmul.bf16.gmra.mxu0 %v3796_v26 }
 0x22c   : > { %v2002_v46 = vadd.f32 %v1933_v39, %v1328_v43  ;;  %1796 = vmatmul.bf16.gmra.mxu2 %v3597_v45  ;;  %1885 = vmatmul.bf16.gmra.mxu3 %v1524_v53  ;;  %v2722_v45 = vld [vmem:[%s3137_s4 + $0x172] sm:$0xff] }
 0x22e   : > { %v2964_v12 = vpack.c.bf16 %v2002_v46, %v2001_v63  ;;  %v2097_v32 = vadd.f32 %v2096_v21, %v2002_v46  ;;  %v2135_v6 = vmul.f32 %v2002_v46, %v2002_v46  ;;  %v3808_v63 = vpack.c.bf16 %v2722_v45, %v2721_v8 }
 0x22f   : > { %v1757_v36 = vpop.f32.mrf.mxu2  ;;  %v1846_v28 = vpop.f32.mrf.mxu3  ;;  %v1527_v21 = vpack.c.bf16 %v2690_v29, %v2689_v0 }
 0x230   : > { %3028 = vst [vmem:[%s3762_s20 + $0x18] sm:$0xff] %v2964_v12   ;;  %v2166_v47 = vadd.f32 %v2165_v23, %v2135_v6  ;;  %v1847_v49 = vadd.f32 %v1846_v28, %v1757_v36  ;;  %v1332_v19 = vpop.f32.mrf.mxu1  ;;  %v1937_v38 = vpop.f32.mrf.mxu0  ;;  %v2659_v12 = vld [vmem:[%s3137_s4 + $0x180] sm:$0xff]  ;;  %v2724_v6 = vld [vmem:[%s3137_s4 + $0x18a] sm:$0xff] }
 0x231   : > { %v1333_v25 = vadd.f32 %v1332_v19, %v3585_v24  ;;  %v2660_v36 = vld [vmem:[%s3137_s4 + $0x188] sm:$0xff] }
 0x232   : > { %v1936_v35 = vadd.f32 %v1935_v37, %v1847_v49  ;;  %v2691_v28 = vld [vmem:[%s3137_s4 + $0x181] sm:$0xff]  ;;  %v1529_v29 = vpack.c.bf16 %v2660_v36, %v2659_v12 }
 0x234   : > { %v2003_v55 = vadd.f32 %v1936_v35, %v1331_v41 }
 0x236   : > { %v2098_v40 = vadd.f32 %v2097_v32, %v2003_v55  ;;  %v2136_v59 = vmul.f32 %v2003_v55, %v2003_v55  ;;  %v2723_v32 = vld [vmem:[%s3137_s4 + $0x182] sm:$0xff] }
 0x237   : > { %v1759_v44 = vpop.f32.mrf.mxu2  ;;  %v1848_v4 = vpop.f32.mrf.mxu3  ;;  %v1531_v35 = vpack.c.bf16 %v2724_v6, %v2723_v32 }
 0x238   : > { %v2167_v17 = vadd.f32 %v2166_v47, %v2136_v59  ;;  %v1849_v58 = vadd.f32 %v1848_v4, %v1759_v44  ;;  %v1335_v60 = vpop.f32.mrf.mxu1  ;;  %v1940_v52 = vpop.f32.mrf.mxu0  ;;  %v2692_v47 = vld [vmem:[%s3137_s4 + $0x189] sm:$0xff] }
 0x239   : > { %v1336_v39 = vadd.f32 %v1335_v60, %v3591_v15  ;;  %v1530_v15 = vpack.c.bf16 %v2692_v47, %v2691_v28 }
 0x23a   : > { %v1938_v11 = vadd.f32 %v1937_v38, %v1849_v58 }
 0x23b   : > { %1374 = vmatmul.bf16.gmra.mxu1 %v3784_v10  ;;  %1979 = vmatmul.bf16.gmra.mxu0 %v3808_v63 }
 0x23c   : > { %v2004_v9 = vadd.f32 %v1938_v11, %v1333_v25  ;;  %1801 = vmatmul.bf16.gmra.mxu2 %v3612_v5  ;;  %1890 = vmatmul.bf16.gmra.mxu3 %v1527_v21 }
 0x23e   : > { %v2969_v62 = vpack.c.bf16 %v2004_v9, %v2003_v55  ;;  %v2099_v23 = vadd.f32 %v2098_v40, %v2004_v9  ;;  %v2137_v1 = vmul.f32 %v2004_v9, %v2004_v9 }
 0x23f   : > { %v1762_v3 = vpop.f32.mrf.mxu2  ;;  %v1851_v24 = vpop.f32.mrf.mxu3 }
 0x240   : > { %3029 = vst [vmem:[%s3762_s20 + $0x20] sm:$0xff] %v2969_v62   ;;  %v2168_v37 = vadd.f32 %v2167_v17, %v2137_v1  ;;  %v1852_v10 = vadd.f32 %v1851_v24, %v1762_v3  ;;  %v1337_v53 = vpop.f32.mrf.mxu1  ;;  %v1942_v43 = vpop.f32.mrf.mxu0  ;;  %v2725_v1 = vld [vmem:[%s3137_s4 + $0x19a] sm:$0xff]  ;;  %v2726_v3 = vld [vmem:[%s3137_s4 + $0x1a2] sm:$0xff] }
 0x241   : > { %v1338_v40 = vadd.f32 %v1337_v53, %v3600_v42  ;;  %v2662_v24 = vld [vmem:[%s3137_s4 + $0x1a0] sm:$0xff] }
 0x242   : > { %v1941_v46 = vadd.f32 %v1940_v52, %v1852_v10  ;;  %v2694_v10 = vld [vmem:[%s3137_s4 + $0x1a1] sm:$0xff] }
 0x244   : > { %v2005_v5 = vadd.f32 %v1941_v46, %v1336_v39 }
 0x246   : > { %v2100_v49 = vadd.f32 %v2099_v23, %v2005_v5  ;;  %v2138_v19 = vmul.f32 %v2005_v5, %v2005_v5  ;;  %v2661_v23 = vld [vmem:[%s3137_s4 + $0x198] sm:$0xff] }
 0x247   : > { %v1764_v38 = vpop.f32.mrf.mxu2  ;;  %v1853_v41 = vpop.f32.mrf.mxu3  ;;  %v1532_v28 = vpack.c.bf16 %v2662_v24, %v2661_v23 }
 0x248   : > { %v2169_v55 = vadd.f32 %v2168_v37, %v2138_v19  ;;  %v1854_v8 = vadd.f32 %v1853_v41, %v1764_v38  ;;  %v1340_v45 = vpop.f32.mrf.mxu1  ;;  %v1945_v0 = vpop.f32.mrf.mxu0  ;;  %v2693_v37 = vld [vmem:[%s3137_s4 + $0x199] sm:$0xff]  ;;  %s2294_s4 = sshll.u32 %s3874_s13, 1 }
 0x249   : > { %v1341_v11 = vadd.f32 %v1340_v45, %v3606_v7  ;;  %v1533_v7 = vpack.c.bf16 %v2694_v10, %v2693_v37  ;;  %s181_s23 = scalar_lea.vmem %s3872_s3, %s2294_s4 }
 0x24a   : > { %v1943_v59 = vadd.f32 %v1942_v43, %v1854_v8 }
 0x24b   : > { %1379 = vmatmul.bf16.gmra.mxu1 %v3796_v26  ;;  %1984 = vmatmul.bf16.gmra.mxu0 %v1531_v35 }
 0x24c   : > { %v2006_v44 = vadd.f32 %v1943_v59, %v1338_v40  ;;  %1806 = vmatmul.bf16.gmra.mxu2 %v1529_v29  ;;  %1895 = vmatmul.bf16.gmra.mxu3 %v1530_v15 }
 0x24e   : > { %v2974_v4 = vpack.c.bf16 %v2006_v44, %v2005_v5  ;;  %v2101_v17 = vadd.f32 %v2100_v49, %v2006_v44  ;;  %v2139_v58 = vmul.f32 %v2006_v44, %v2006_v44  ;;  %v1534_v5 = vpack.c.bf16 %v2726_v3, %v2725_v1 }
 0x24f   : > { %v1767_v60 = vpop.f32.mrf.mxu2  ;;  %v1856_v52 = vpop.f32.mrf.mxu3 }
 0x250   : > { %3030 = vst [vmem:[%s3762_s20 + $0x28] sm:$0xff] %v2974_v4   ;;  %v2170_v42 = vadd.f32 %v2169_v55, %v2139_v58  ;;  %v1857_v21 = vadd.f32 %v1856_v52, %v1767_v60  ;;  %v1342_v25 = vpop.f32.mrf.mxu1  ;;  %v1947_v26 = vpop.f32.mrf.mxu0 }
 0x251   : > { %v1343_v47 = vadd.f32 %v1342_v25, %v3615_v18 }
 0x252   : > { %v1946_v9 = vadd.f32 %v1945_v0, %v1857_v21 }
 0x254   : > { %v2007_v62 = vadd.f32 %v1946_v9, %v1341_v11 }
 0x256   : > { %v2102_v53 = vadd.f32 %v2101_v17, %v2007_v62  ;;  %v2140_v43 = vmul.f32 %v2007_v62, %v2007_v62 }
 0x257   : > { %v1769_v39 = vpop.f32.mrf.mxu2  ;;  %v1858_v46 = vpop.f32.mrf.mxu3 }
 0x258   : > { %v2171_v12 = vadd.f32 %v2170_v42, %v2140_v43  ;;  %v1859_v32 = vadd.f32 %v1858_v46, %v1769_v39  ;;  %v1345_v6 = vpop.f32.mrf.mxu1  ;;  %v1950_v36 = vpop.f32.mrf.mxu0 }
 0x259   : > { %v1346_v40 = vadd.f32 %v1345_v6, %v3620_v56 }
 0x25a   : > { %v1948_v49 = vadd.f32 %v1947_v26, %v1859_v32 }
 0x25b   : > { %1384 = vmatmul.bf16.gmra.mxu1 %v3808_v63  ;;  %1989 = vmatmul.bf16.gmra.mxu0 %v1534_v5 }
 0x25c   : > { %v2008_v19 = vadd.f32 %v1948_v49, %v1343_v47  ;;  %1811 = vmatmul.bf16.gmra.mxu2 %v1532_v28  ;;  %1900 = vmatmul.bf16.gmra.mxu3 %v1533_v7 }
 0x25e   : > { %v2979_v38 = vpack.c.bf16 %v2008_v19, %v2007_v62  ;;  %v2103_v41 = vadd.f32 %v2102_v53, %v2008_v19  ;;  %v2141_v35 = vmul.f32 %v2008_v19, %v2008_v19 }
 0x25f   : > { %v1772_v55 = vpop.f32.mrf.mxu2  ;;  %v1861_v8 = vpop.f32.mrf.mxu3 }
 0x260   : > { %3031 = vst [vmem:[%s3762_s20 + $0x30] sm:$0xff] %v2979_v38   ;;  %v2172_v45 = vadd.f32 %v2171_v12, %v2141_v35  ;;  %v1862_v0 = vadd.f32 %v1861_v8, %v1772_v55  ;;  %v1347_v29 = vpop.f32.mrf.mxu1  ;;  %v1952_v15 = vpop.f32.mrf.mxu0 }
 0x261   : > { %v1348_v21 = vadd.f32 %v1347_v29, %v3627_v16 }
 0x262   : > { %v1951_v18 = vadd.f32 %v1950_v36, %v1862_v0 }
 0x264   : > { %v2009_v59 = vadd.f32 %v1951_v18, %v1346_v40 }
 0x266   : > { %v2104_v44 = vadd.f32 %v2103_v41, %v2009_v59  ;;  %v2142_v63 = vmul.f32 %v2009_v59, %v2009_v59 }
 0x267   : > { %v1774_v4 = vpop.f32.mrf.mxu2  ;;  %v1863_v17 = vpop.f32.mrf.mxu3 }
 0x268   : > { %v2173_v58 = vadd.f32 %v2172_v45, %v2142_v63  ;;  %v1864_v60 = vadd.f32 %v1863_v17, %v1774_v4  ;;  %v1350_v52 = vpop.f32.mrf.mxu1  ;;  %v1955_v42 = vpop.f32.mrf.mxu0 }
 0x269   : > { %v1351_v10 = vadd.f32 %v1350_v52, %v3635_v61 }
 0x26a   : > { %v1953_v25 = vadd.f32 %v1952_v15, %v1864_v60 }
 0x26c   : > { %v2010_v26 = vadd.f32 %v1953_v25, %v1348_v21 }
 0x26e   : > { %v2984_v11 = vpack.c.bf16 %v2010_v26, %v2009_v59  ;;  %v2105_v9 = vadd.f32 %v2104_v44, %v2010_v26  ;;  %v2143_v62 = vmul.f32 %v2010_v26, %v2010_v26 }
 0x26f   : > { %v1777_v23 = vpop.f32.mrf.mxu2  ;;  %v1866_v56 = vpop.f32.mrf.mxu3 }
 0x270   : > { %3032 = vst [vmem:[%s3762_s20 + $0x38] sm:$0xff] %v2984_v11   ;;  %v2174_v1 = vadd.f32 %v2173_v58, %v2143_v62  ;;  %v1867_v3 = vadd.f32 %v1866_v56, %v1777_v23  ;;  %v1352_v24 = vpop.f32.mrf.mxu1  ;;  %v1957_v37 = vpop.f32.mrf.mxu0 }
 0x271   : > { %v1353_v28 = vadd.f32 %v1352_v24, %v3644_v33 }
 0x272   : > { %v1956_v53 = vadd.f32 %v1955_v42, %v1867_v3 }
 0x274   : > { %v2011_v43 = vadd.f32 %v1956_v53, %v1351_v10 }
 0x276   : > { %v2106_v39 = vadd.f32 %v2105_v9, %v2011_v43  ;;  %v2144_v46 = vmul.f32 %v2011_v43, %v2011_v43 }
 0x277   : > { %v1779_v16 = vpop.f32.mrf.mxu2  ;;  %v1868_v5 = vpop.f32.mrf.mxu3 }
 0x278   : > { %v2175_v12 = vadd.f32 %v2174_v1, %v2144_v46  ;;  %v1869_v32 = vadd.f32 %v1868_v5, %v1779_v16  ;;  %v1355_v6 = vpop.f32.mrf.mxu1  ;;  %v1960_v36 = vpop.f32.mrf.mxu0 }
 0x279   : > { %v1356_v0 = vadd.f32 %v1355_v6, %v3652_v54 }
 0x27a   : > { %v1958_v7 = vadd.f32 %v1957_v37, %v1869_v32 }
 0x27c   : > { %v2012_v47 = vadd.f32 %v1958_v7, %v1353_v28 }
 0x27e   : > { %v2989_v49 = vpack.c.bf16 %v2012_v47, %v2011_v43  ;;  %v2107_v19 = vadd.f32 %v2106_v39, %v2012_v47  ;;  %v2145_v38 = vmul.f32 %v2012_v47, %v2012_v47 }
 0x27f   : > { %v1782_v41 = vpop.f32.mrf.mxu2  ;;  %v1871_v61 = vpop.f32.mrf.mxu3 }
 0x280   : > { %3033 = vst [vmem:[%s3762_s20 + $0x40] sm:$0xff] %v2989_v49   ;;  %v2176_v35 = vadd.f32 %v2175_v12, %v2145_v38  ;;  %v1872_v55 = vadd.f32 %v1871_v61, %v1782_v41  ;;  %v1357_v8 = vpop.f32.mrf.mxu1  ;;  %v1962_v45 = vpop.f32.mrf.mxu0 }
 0x281   : > { %v1358_v58 = vadd.f32 %v1357_v8, %v3661_v50 }
 0x282   : > { %v1961_v29 = vadd.f32 %v1960_v36, %v1872_v55 }
 0x284   : > { %v2013_v15 = vadd.f32 %v1961_v29, %v1356_v0 }
 0x286   : > { %v2108_v40 = vadd.f32 %v2107_v19, %v2013_v15  ;;  %v2146_v18 = vmul.f32 %v2013_v15, %v2013_v15 }
 0x287   : > { %v1784_v33 = vpop.f32.mrf.mxu2  ;;  %v1873_v59 = vpop.f32.mrf.mxu3 }
 0x288   : > { %v2177_v44 = vadd.f32 %v2176_v35, %v2146_v18  ;;  %v1874_v63 = vadd.f32 %v1873_v59, %v1784_v33  ;;  %v1360_v4 = vpop.f32.mrf.mxu1  ;;  %v1965_v17 = vpop.f32.mrf.mxu0 }
 0x289   : > { %v1361_v56 = vadd.f32 %v1360_v4, %v3667_v31 }
 0x28a   : > { %v1963_v60 = vadd.f32 %v1962_v45, %v1874_v63 }
 0x28c   : > { %v2014_v52 = vadd.f32 %v1963_v60, %v1358_v58 }
 0x28e   : > { %v2994_v42 = vpack.c.bf16 %v2014_v52, %v2013_v15  ;;  %v2109_v21 = vadd.f32 %v2108_v40, %v2014_v52  ;;  %v2147_v25 = vmul.f32 %v2014_v52, %v2014_v52 }
 0x28f   : > { %v1787_v26 = vpop.f32.mrf.mxu2  ;;  %v1876_v54 = vpop.f32.mrf.mxu3 }
 0x290   : > { %3034 = vst [vmem:[%s3762_s20 + $0x48] sm:$0xff] %v2994_v42   ;;  %v2178_v11 = vadd.f32 %v2177_v44, %v2147_v25  ;;  %v1877_v9 = vadd.f32 %v1876_v54, %v1787_v26  ;;  %v1362_v62 = vpop.f32.mrf.mxu1  ;;  %v1967_v23 = vpop.f32.mrf.mxu0 }
 0x291   : > { %v1363_v16 = vadd.f32 %v1362_v62, %v3677_v2 }
 0x292   : > { %v1966_v1 = vadd.f32 %v1965_v17, %v1877_v9 }
 0x294   : > { %v2015_v3 = vadd.f32 %v1966_v1, %v1361_v56 }
 0x296   : > { %v2110_v24 = vadd.f32 %v2109_v21, %v2015_v3  ;;  %v2148_v37 = vmul.f32 %v2015_v3, %v2015_v3 }
 0x297   : > { %v1789_v50 = vpop.f32.mrf.mxu2  ;;  %v1878_v10 = vpop.f32.mrf.mxu3 }
 0x298   : > { %v2179_v53 = vadd.f32 %v2178_v11, %v2148_v37  ;;  %v1879_v43 = vadd.f32 %v1878_v10, %v1789_v50  ;;  %v1365_v39 = vpop.f32.mrf.mxu1  ;;  %v1970_v46 = vpop.f32.mrf.mxu0 }
 0x299   : > { %v1366_v38 = vadd.f32 %v1365_v39, %v3683_v13 }
 0x29a   : > { %v1968_v5 = vadd.f32 %v1967_v23, %v1879_v43 }
 0x29c   : > { %v2016_v12 = vadd.f32 %v1968_v5, %v1363_v16 }
 0x29e   : > { %v2999_v32 = vpack.c.bf16 %v2016_v12, %v2015_v3  ;;  %v2111_v6 = vadd.f32 %v2110_v24, %v2016_v12  ;;  %v2149_v36 = vmul.f32 %v2016_v12, %v2016_v12 }
 0x29f   : > { %v1792_v28 = vpop.f32.mrf.mxu2  ;;  %v1881_v31 = vpop.f32.mrf.mxu3 }
 0x2a0   : > { %3035 = vst [vmem:[%s3762_s20 + $0x50] sm:$0xff] %v2999_v32   ;;  %v2180_v7 = vadd.f32 %v2179_v53, %v2149_v36  ;;  %v1882_v47 = vadd.f32 %v1881_v31, %v1792_v28  ;;  %v1367_v49 = vpop.f32.mrf.mxu1  ;;  %v1972_v19 = vpop.f32.mrf.mxu0 }
 0x2a1   : > { %v1368_v40 = vadd.f32 %v1367_v49, %v3693_v27 }
 0x2a2   : > { %v1971_v41 = vadd.f32 %v1970_v46, %v1882_v47 }
 0x2a4   : > { %v2017_v61 = vadd.f32 %v1971_v41, %v1366_v38 }
 0x2a6   : > { %v2112_v35 = vadd.f32 %v2111_v6, %v2017_v61  ;;  %v2150_v55 = vmul.f32 %v2017_v61, %v2017_v61 }
 0x2a7   : > { %v1794_v2 = vpop.f32.mrf.mxu2  ;;  %v1883_v8 = vpop.f32.mrf.mxu3 }
 0x2a8   : > { %v2181_v45 = vadd.f32 %v2180_v7, %v2150_v55  ;;  %v1884_v0 = vadd.f32 %v1883_v8, %v1794_v2  ;;  %v1370_v29 = vpop.f32.mrf.mxu1  ;;  %v1975_v15 = vpop.f32.mrf.mxu0 }
 0x2a9   : > { %v1371_v42 = vadd.f32 %v1370_v29, %v3699_v57 }
 0x2aa   : > { %v1973_v18 = vadd.f32 %v1972_v19, %v1884_v0 }
 0x2ac   : > { %v2018_v33 = vadd.f32 %v1973_v18, %v1368_v40 }
 0x2ae   : > { %v3004_v59 = vpack.c.bf16 %v2018_v33, %v2017_v61  ;;  %v2113_v44 = vadd.f32 %v2112_v35, %v2018_v33  ;;  %v2151_v63 = vmul.f32 %v2018_v33, %v2018_v33 }
 0x2af   : > { %v1797_v4 = vpop.f32.mrf.mxu2  ;;  %v1886_v13 = vpop.f32.mrf.mxu3 }
 0x2b0   : > { %3036 = vst [vmem:[%s3762_s20 + $0x58] sm:$0xff] %v3004_v59   ;;  %v2182_v17 = vadd.f32 %v2181_v45, %v2151_v63  ;;  %v1887_v58 = vadd.f32 %v1886_v13, %v1797_v4  ;;  %v1372_v60 = vpop.f32.mrf.mxu1  ;;  %v1977_v52 = vpop.f32.mrf.mxu0 }
 0x2b1   : > { %v1373_v1 = vadd.f32 %v1372_v60, %v3709_v34 }
 0x2b2   : > { %v1976_v21 = vadd.f32 %v1975_v15, %v1887_v58 }
 0x2b4   : > { %v2019_v25 = vadd.f32 %v1976_v21, %v1371_v42 }
 0x2b6   : > { %v2114_v26 = vadd.f32 %v2113_v44, %v2019_v25  ;;  %v2152_v54 = vmul.f32 %v2019_v25, %v2019_v25 }
 0x2b7   : > { %v1799_v27 = vpop.f32.mrf.mxu2  ;;  %v1888_v11 = vpop.f32.mrf.mxu3 }
 0x2b8   : > { %v2183_v9 = vadd.f32 %v2182_v17, %v2152_v54  ;;  %v1889_v62 = vadd.f32 %v1888_v11, %v1799_v27  ;;  %v1375_v23 = vpop.f32.mrf.mxu1  ;;  %v1980_v56 = vpop.f32.mrf.mxu0 }
 0x2b9   : > { %v1376_v5 = vadd.f32 %v1375_v23, %v3715_v48 }
 0x2ba   : > { %v1978_v3 = vadd.f32 %v1977_v52, %v1889_v62 }
 0x2bc   : > { %v2020_v24 = vadd.f32 %v1978_v3, %v1373_v1 }
 0x2be   : > { %v3009_v37 = vpack.c.bf16 %v2020_v24, %v2019_v25  ;;  %v2115_v50 = vadd.f32 %v2114_v26, %v2020_v24  ;;  %v2153_v10 = vmul.f32 %v2020_v24, %v2020_v24 }
 0x2bf   : > { %v1802_v53 = vpop.f32.mrf.mxu2  ;;  %v1891_v57 = vpop.f32.mrf.mxu3 }
 0x2c0   : > { %3037 = vst [vmem:[%s3762_s20 + $0x60] sm:$0xff] %v3009_v37   ;;  %v2184_v43 = vadd.f32 %v2183_v9, %v2153_v10  ;;  %v1892_v39 = vadd.f32 %v1891_v57, %v1802_v53  ;;  %v1377_v46 = vpop.f32.mrf.mxu1  ;;  %v1982_v16 = vpop.f32.mrf.mxu0 }
 0x2c1   : > { %v1378_v49 = vadd.f32 %v1377_v46, %v3722_v51 }
 0x2c2   : > { %v1981_v12 = vadd.f32 %v1980_v56, %v1892_v39 }
 0x2c4   : > { %v2021_v32 = vadd.f32 %v1981_v12, %v1376_v5 }
 0x2c6   : > { %v2116_v6 = vadd.f32 %v2115_v50, %v2021_v32  ;;  %v2154_v36 = vmul.f32 %v2021_v32, %v2021_v32 }
 0x2c7   : > { %v1804_v34 = vpop.f32.mrf.mxu2  ;;  %v1893_v28 = vpop.f32.mrf.mxu3 }
 0x2c8   : > { %v2185_v31 = vadd.f32 %v2184_v43, %v2154_v36  ;;  %v1894_v7 = vadd.f32 %v1893_v28, %v1804_v34  ;;  %v1380_v47 = vpop.f32.mrf.mxu1  ;;  %v1985_v38 = vpop.f32.mrf.mxu0 }
 0x2c9   : > { %v1381_v0 = vadd.f32 %v1380_v47, %v3728_v14 }
 0x2ca   : > { %v1983_v19 = vadd.f32 %v1982_v16, %v1894_v7 }
 0x2cc   : > { %v2022_v41 = vadd.f32 %v1983_v19, %v1378_v49 }
 0x2ce   : > { %v3014_v61 = vpack.c.bf16 %v2022_v41, %v2021_v32  ;;  %v2117_v35 = vadd.f32 %v2116_v6, %v2022_v41  ;;  %v2155_v55 = vmul.f32 %v2022_v41, %v2022_v41 }
 0x2cf   : > { %v1807_v2 = vpop.f32.mrf.mxu2  ;;  %v1896_v48 = vpop.f32.mrf.mxu3 }
 0x2d0   : > { %3038 = vst [vmem:[%s3762_s20 + $0x68] sm:$0xff] %v3014_v61   ;;  %v2186_v8 = vadd.f32 %v2185_v31, %v2155_v55  ;;  %v1897_v45 = vadd.f32 %v1896_v48, %v1807_v2  ;;  %v1382_v15 = vpop.f32.mrf.mxu1  ;;  %v1987_v18 = vpop.f32.mrf.mxu0 }
 0x2d1   : > { %v1383_v13 = vadd.f32 %v1382_v15, %v3735_v22 }
 0x2d2   : > { %v1986_v29 = vadd.f32 %v1985_v38, %v1897_v45 }
 0x2d4   : > { %v2023_v40 = vadd.f32 %v1986_v29, %v1381_v0 }
 0x2d6   : > { %v2118_v33 = vadd.f32 %v2117_v35, %v2023_v40  ;;  %v2156_v51 = vmul.f32 %v2023_v40, %v2023_v40 }
 0x2d7   : > { %v1809_v59 = vpop.f32.mrf.mxu2  ;;  %v1898_v44 = vpop.f32.mrf.mxu3 }
 0x2d8   : > { %v2187_v63 = vadd.f32 %v2186_v8, %v2156_v51  ;;  %v1899_v4 = vadd.f32 %v1898_v44, %v1809_v59  ;;  %v1385_v60 = vpop.f32.mrf.mxu1  ;;  %v1990_v14 = vpop.f32.mrf.mxu0 }
 0x2d9   : > { %v1386_v11 = vadd.f32 %v1385_v60, %v3738_v20 }
 0x2da   : > { %v1988_v17 = vadd.f32 %v1987_v18, %v1899_v4 }
 0x2dc   : > { %v2024_v58 = vadd.f32 %v1988_v17, %v1383_v13 }
 0x2de   : > { %v3019_v52 = vpack.c.bf16 %v2024_v58, %v2023_v40  ;;  %v2119_v42 = vadd.f32 %v2118_v33, %v2024_v58  ;;  %v2157_v21 = vmul.f32 %v2024_v58, %v2024_v58 }
 0x2df   : > { %v1812_v25 = vpop.f32.mrf.mxu2  ;;  %v1901_v26 = vpop.f32.mrf.mxu3 }
 0x2e0   : > { %3039 = vst [vmem:[%s3762_s20 + $0x70] sm:$0xff] %v3019_v52   ;;  %v2188_v54 = vadd.f32 %v2187_v63, %v2157_v21  ;;  %v1902_v27 = vadd.f32 %v1901_v26, %v1812_v25  ;;  %v1387_v22 = vpop.f32.mrf.mxu1  ;;  %v1992_v50 = vpop.f32.mrf.mxu0 }
 0x2e1   : > { %v1388_v10 = vadd.f32 %v1387_v22, %v3745_v30 }
 0x2e2   : > { %v1991_v9 = vadd.f32 %v1990_v14, %v1902_v27 }
 0x2e4   : > { %v2025_v62 = vadd.f32 %v1991_v9, %v1386_v11 }
 0x2e6   : > { %v2120_v23 = vadd.f32 %v2119_v42, %v2025_v62  ;;  %v2158_v56 = vmul.f32 %v2025_v62, %v2025_v62 }
 0x2e7   : > { %v1814_v1 = vpop.f32.mrf.mxu2  ;;  %v1903_v3 = vpop.f32.mrf.mxu3 }
 0x2e8   : > { %v2189_v24 = vadd.f32 %v2188_v54, %v2158_v56  ;;  %v1904_v37 = vadd.f32 %v1903_v3, %v1814_v1 }
 0x2ea   : > { %v1993_v53 = vadd.f32 %v1992_v50, %v1904_v37 }
 0x2ec   : > { %v2026_v57 = vadd.f32 %v1993_v53, %v1388_v10 }
 0x2ee   : > { %v3024_v43 = vpack.c.bf16 %v2026_v57, %v2025_v62  ;;  %v2121_v39 = vadd.f32 %v2120_v23, %v2026_v57  ;;  %v2159_v46 = vmul.f32 %v2026_v57, %v2026_v57 }
 0x2f0   : > { %3040 = vst [vmem:[%s3762_s20 + $0x78] sm:$0xff] %v3024_v43   ;;  %v2122_v20 = vrot.slane %v2121_v39, 4  ;;  %v2190_v16 = vadd.f32 %v2189_v24, %v2159_v46 }
 0x2f2   : > { %v2123_v5 = vadd.f32 %v2122_v20, %v2121_v39  ;;  %v2191_v12 = vrot.slane %v2190_v16, 4 }
 0x2f4   : > { %v2124_v32 = vrot.slane %v2123_v5, 2  ;;  %v2192_v6 = vadd.f32 %v2191_v12, %v2190_v16 }
 0x2f6   : > { %v2125_v36 = vadd.f32 %v2124_v32, %v2123_v5  ;;  %v2193_v34 = vrot.slane %v2192_v6, 2 }
 0x2f8   : > { %v2126_v28 = vrot.slane %v2125_v36, 1  ;;  %v2194_v31 = vadd.f32 %v2193_v34, %v2192_v6 }
 0x2fa   : > { %v2195_v7 = vrot.slane %v2194_v31, 1  ;;  %v2127_v30 = vadd.f32 %v2126_v28, %v2125_v36 }
 0x2fc   : > { %v2196_v47 = vadd.f32 %v2195_v7, %v2194_v31 }
 0x2fe   : > { %v2198_v49 = vsel %vm2197_vm0, %v2127_v30, %v2196_v47 }
 0x2ff   : > { %2199 = vst [vmem:[%s181_s23] sm:$0x3] %v2198_v49 }
 0x300 PF: > { %s14_s12 = sadd.s32 1, %s3080_s12  }
 0x301   : > { %p11_p4 = scmp.ge.s32.totalorder %s14_s12, 4  }
 0x303   :  { %13 = sbr.rel (!%p11_p4) target bundleno = 1 (0x1), region = 74 }

</bundles_post_ra>
